<compile_context>
chip_gen: v7x
topology: tpu7x:2x2x1
jax: 0.10.0
libtpu: 0.0.40
codegen_flags: <defaults>
</compile_context>

<pallas_src>
import functools

import jax
import jax.numpy as jnp
from jax import lax
from jax.experimental import pallas as pl
from jax.experimental.pallas import tpu as pltpu


def ffn_kernel(x_ref, w1_ref, b1_ref, w2_ref, b2_ref, o_ref, acc_ref,
               *, hc, n_chunks):
    # x_ref:  (tm, C)  activation tile (input dtype, cast to bf16 here)
    # w1_ref: (C, H)   bf16, VMEM-resident (constant index_map)
    # b1_ref: (1, H)   f32
    # w2_ref: (H, C)   bf16, VMEM-resident
    # b2_ref: (1, C)   f32
    # o_ref:  (tm, C)  output tile
    # acc_ref:(tm, C)  f32 scratch accumulator

    # Cast the activation tile to bf16 once, in-kernel (hides under MXU work;
    # no wrapper-side HBM cast pass).
    x_bf = x_ref[...].astype(jnp.bfloat16)

    acc_ref[...] = jnp.zeros_like(acc_ref)

    def chunk(j, carry):
        h0 = pl.multiple_of(j * hc, hc)
        # Linear 1 (chunk of columns): bf16 x bf16 on the MXU, f32 accumulation.
        h = jnp.dot(x_bf, w1_ref[:, pl.ds(h0, hc)],
                    preferred_element_type=jnp.float32)
        # Bias + ReLU in f32 on the VPU.
        h = jnp.maximum(h + b1_ref[:, pl.ds(h0, hc)], 0.0)
        # Linear 2 (chunk of rows): cast back to bf16 only at the MXU boundary,
        # accumulate in the f32 scratch.
        acc_ref[...] += jnp.dot(h.astype(jnp.bfloat16),
                                w2_ref[pl.ds(h0, hc), :],
                                preferred_element_type=jnp.float32)
        return carry

    lax.fori_loop(0, n_chunks, chunk, 0, unroll=True)

    # Dropout: identity at inference time (p=0.2 only active in training).
    o_ref[...] = (acc_ref[...] + b2_ref[...]).astype(o_ref.dtype)


def _round_up(n, m):
    return ((n + m - 1) // m) * m


def _tpu_generation():
    devs = jax.devices()
    kind = devs[0].device_kind.lower() if devs else ""
    if "v5 lite" in kind or "v5e" in kind or "v5lite" in kind:
        return "v5e"
    if "v6" in kind:
        return "v6e"
    if "v7" in kind:
        return "v7x"
    return "other"


def _pick_tm(M, gen):
    # bf16 vregs pack (16,128): never go below 16 rows.
    base = 256 if gen == "v5e" else 512
    tm = min(base, _round_up(max(M, 1), 16))
    if gen == "v7x" and M >= 32:
        # Guarantee >= 2 grid steps so both TensorCores get work.
        tm = min(tm, _round_up(pl.cdiv(M, 2), 16))
    return max(16, tm)


def feed_forward(x, w1, b1, w2, b2, *, tm=None, hidden_chunk=512):
    """x: (B, T, C). Returns (B, T, C). Eval-mode FFN (dropout = identity).

    Weights are expected in bf16 (stored that way); f32 weights are accepted
    but cost an extra cast pass per call.
    """
    B, T, C = x.shape
    H = w1.shape[-1]
    M = B * T

    gen = _tpu_generation()
    if tm is None:
        tm = _pick_tm(M, gen)
    else:
        tm = max(16, min(tm, _round_up(M, 16)))
    Mp = _round_up(M, tm)

    x2d = x.reshape(M, C)
    if Mp != M:
        x2d = jnp.pad(x2d, ((0, Mp - M), (0, 0)))

    # MXU weight operands in bf16: no-op if already stored in bf16.
    w1_bf = w1 if w1.dtype == jnp.bfloat16 else w1.astype(jnp.bfloat16)
    w2_bf = w2 if w2.dtype == jnp.bfloat16 else w2.astype(jnp.bfloat16)
    b1_f32 = b1.reshape(1, H).astype(jnp.float32)
    b2_f32 = b2.reshape(1, C).astype(jnp.float32)

    # Hidden-dim chunking (keeps the (tm, H) f32 intermediate bounded).
    hc = hidden_chunk if (H > hidden_chunk and H % hidden_chunk == 0) else H
    n_chunks = H // hc

    kernel = functools.partial(ffn_kernel, hc=hc, n_chunks=n_chunks)

    out_itemsize = int(jnp.dtype(x.dtype).itemsize)
    flops = int(4 * Mp * C * H)                          # 2 matmuls, 2*M*C*H each
    bytes_accessed = int(
        Mp * C * out_itemsize                            # activations in
        + Mp * C * out_itemsize                          # output
        + 2 * C * H * 2                                  # W1 + W2 (bf16)
        + (H + C) * 4                                    # biases (f32)
    )

    grid_spec = pltpu.PrefetchScalarGridSpec(
        num_scalar_prefetch=0,
        grid=(Mp // tm,),
        in_specs=[
            pl.BlockSpec((tm, C), lambda i: (i, 0)),     # activations, row-tiled
            pl.BlockSpec((C, H), lambda i: (0, 0)),      # W1, VMEM-resident
            pl.BlockSpec((1, H), lambda i: (0, 0)),      # b1
            pl.BlockSpec((H, C), lambda i: (0, 0)),      # W2, VMEM-resident
            pl.BlockSpec((1, C), lambda i: (0, 0)),      # b2
        ],
        out_specs=pl.BlockSpec((tm, C), lambda i: (i, 0)),
        scratch_shapes=[pltpu.VMEM((tm, C), jnp.float32)],
    )

    out2d = pl.pallas_call(
        kernel,
        out_shape=jax.ShapeDtypeStruct((Mp, C), x.dtype),
        grid_spec=grid_spec,
        compiler_params=pltpu.CompilerParams(
            dimension_semantics=("parallel",),           # shards rows across TCs on v7x
        ),
        cost_estimate=pl.CostEstimate(
            flops=flops, transcendentals=0, bytes_accessed=bytes_accessed),
    )(x2d, w1_bf, b1_f32, w2_bf, b2_f32)

    return out2d[:M].reshape(B, T, C)


def init_params(key, n_embd, weight_dtype=jnp.bfloat16):
    """Init matching torch.nn.Linear default: U(-1/sqrt(in), 1/sqrt(in)).

    Weights are stored in bf16 (MXU operand dtype) so the kernel never pays a
    per-call weight cast; biases stay f32 (used in the f32 epilogue).
    """
    hidden = 4 * n_embd
    k1, k2, k3, k4 = jax.random.split(key, 4)
    bound1 = 1.0 / jnp.sqrt(n_embd)
    bound2 = 1.0 / jnp.sqrt(hidden)
    w1 = jax.random.uniform(k1, (n_embd, hidden), jnp.float32,
                            -bound1, bound1).astype(weight_dtype)
    b1 = jax.random.uniform(k2, (hidden,), jnp.float32, -bound1, bound1)
    w2 = jax.random.uniform(k3, (hidden, n_embd), jnp.float32,
                            -bound2, bound2).astype(weight_dtype)
    b2 = jax.random.uniform(k4, (n_embd,), jnp.float32, -bound2, bound2)
    return w1, b1, w2, b2


if __name__ == "__main__":
    n_embd = 384          # module's n_embd
    B, T = 2, 8           # small batch / sequence

    key = jax.random.PRNGKey(0)
    kx, kp = jax.random.split(key)
    x = jax.random.normal(kx, (B, T, n_embd), jnp.float32)
    w1, b1, w2, b2 = init_params(kp, n_embd)

    y = jax.block_until_ready(feed_forward(x, w1, b1, w2, b2))
    assert y.shape == (B, T, n_embd)

    # Reference 1: same bf16-operand / f32-accumulation recipe (tight check).
    x_bf = x.reshape(-1, n_embd).astype(jnp.bfloat16)
    h_ref = jnp.maximum(
        jnp.dot(x_bf, w1, preferred_element_type=jnp.float32) + b1, 0.0)
    ref_bf = (jnp.dot(h_ref.astype(jnp.bfloat16), w2,
                      preferred_element_type=jnp.float32) + b2)
    ref_bf = ref_bf.reshape(B, T, n_embd)
    assert jnp.allclose(y, ref_bf, atol=2e-3, rtol=2e-3), "mismatch vs bf16 reference"

    # Reference 2: f32 math with the same (bf16-stored) weights (loose check,
    # activation/intermediate bf16 quantization error only).
    ref_f32 = (jnp.maximum(x.reshape(-1, n_embd) @ w1.astype(jnp.float32) + b1, 0.0)
               @ w2.astype(jnp.float32) + b2)
    ref_f32 = ref_f32.reshape(B, T, n_embd)
    assert jnp.allclose(y, ref_f32, atol=5e-2, rtol=5e-2), "mismatch vs f32 reference"

    print("KERNEL_OK")
</pallas_src>

<mosaic_0001>
module attributes {stable_mosaic.version = 11 : i64} {
  func.func @ffn_kernel(%arg0: i32, %arg1: memref<16x384xf32, #tpu.memory_space<vmem>>, %arg2: memref<384x1536xbf16, #tpu.memory_space<vmem>>, %arg3: memref<1x1536xf32, #tpu.memory_space<vmem>>, %arg4: memref<1536x384xbf16, #tpu.memory_space<vmem>>, %arg5: memref<1x384xf32, #tpu.memory_space<vmem>>, %arg6: memref<16x384xf32, #tpu.memory_space<vmem>>, %arg7: memref<16x384xf32, #tpu.memory_space<vmem>>) attributes {dimension_semantics = [#tpu.dimension_semantics<parallel>], iteration_bounds = array<i64: 1>, scalar_prefetch = 0 : i64, scratch_operands = 1 : i64, tpu.core_type = #tpu.core_type<tc>, window_params = [{transform_indices = @transform_0, window_bounds = array<i64: 16, 384>}, {pipeline_mode = #tpu.pipeline_mode<synchronous>, transform_indices = @transform_1, window_bounds = array<i64: 384, 1536>}, {pipeline_mode = #tpu.pipeline_mode<synchronous>, transform_indices = @transform_2, window_bounds = array<i64: 1, 1536>}, {pipeline_mode = #tpu.pipeline_mode<synchronous>, transform_indices = @transform_3, window_bounds = array<i64: 1536, 384>}, {pipeline_mode = #tpu.pipeline_mode<synchronous>, transform_indices = @transform_4, window_bounds = array<i64: 1, 384>}, {transform_indices = @transform_5, window_bounds = array<i64: 16, 384>}]} {
    %c0 = arith.constant 0 : index
    %c0_0 = arith.constant 0 : index
    %0 = vector.load %arg1[%c0, %c0_0] : memref<16x384xf32, #tpu.memory_space<vmem>>, vector<16x384xf32>
    %1 = arith.truncf %0 : vector<16x384xf32> to vector<16x384xbf16>
    %cst = arith.constant 0.000000e+00 : f32
    %2 = vector.broadcast %cst : f32 to vector<16x384xf32>
    %c0_1 = arith.constant 0 : index
    %c0_2 = arith.constant 0 : index
    %3 = vector.load %arg7[%c0_1, %c0_2] : memref<16x384xf32, #tpu.memory_space<vmem>>, vector<16x384xf32>
    tpu.vector_store %arg7[%c0_1, %c0_2], %2 {strides = array<i32>} : memref<16x384xf32, #tpu.memory_space<vmem>>, vector<16x384xf32>,
    %c0_i32 = arith.constant 0 : i32
    %c512_i32 = arith.constant 512 : i32
    %4 = arith.muli %c0_i32, %c512_i32 : i32
    %5 = tpu.assume_multiple %4, 512 : i32
    %c0_3 = arith.constant 0 : index
    %6 = arith.index_cast %5 : i32 to index
    %7 = vector.load %arg2[%c0_3, %6] : memref<384x1536xbf16, #tpu.memory_space<vmem>>, vector<384x512xbf16>
    %cst_4 = arith.constant dense<0.000000e+00> : vector<16x512xf32>
    %8 = tpu.matmul %1, %7, %cst_4 {dimension_numbers = #tpu.dot_dimension_numbers<[1], [0], [0], [1], [0, 0, 1, 1], [], []>} : vector<16x384xbf16>, vector<384x512xbf16>, vector<16x512xf32> -> vector<16x512xf32>
    %c0_5 = arith.constant 0 : index
    %9 = arith.index_cast %5 : i32 to index
    %10 = vector.load %arg3[%c0_5, %9] : memref<1x1536xf32, #tpu.memory_space<vmem>>, vector<1x512xf32>
    %11 = vector.broadcast %10 : vector<1x512xf32> to vector<16x512xf32>
    %12 = arith.addf %8, %11 : vector<16x512xf32>
    %cst_6 = arith.constant 0.000000e+00 : f32
    %13 = vector.broadcast %cst_6 : f32 to vector<16x512xf32>
    %14 = arith.maximumf %12, %13 : vector<16x512xf32>
    %c0_7 = arith.constant 0 : index
    %c0_8 = arith.constant 0 : index
    %15 = vector.load %arg7[%c0_7, %c0_8] : memref<16x384xf32, #tpu.memory_space<vmem>>, vector<16x384xf32>
    %16 = arith.truncf %14 : vector<16x512xf32> to vector<16x512xbf16>
    %17 = arith.index_cast %5 : i32 to index
    %c0_9 = arith.constant 0 : index
    %18 = vector.load %arg4[%17, %c0_9] : memref<1536x384xbf16, #tpu.memory_space<vmem>>, vector<512x384xbf16>
    %cst_10 = arith.constant dense<0.000000e+00> : vector<16x384xf32>
    %19 = tpu.matmul %16, %18, %cst_10 {dimension_numbers = #tpu.dot_dimension_numbers<[1], [0], [0], [1], [0, 0, 1, 1], [], []>} : vector<16x512xbf16>, vector<512x384xbf16>, vector<16x384xf32> -> vector<16x384xf32>
    %20 = arith.addf %15, %19 : vector<16x384xf32>
    %c0_11 = arith.constant 0 : index
    %c0_12 = arith.constant 0 : index
    %21 = vector.load %arg7[%c0_11, %c0_12] : memref<16x384xf32, #tpu.memory_space<vmem>>, vector<16x384xf32>
    tpu.vector_store %arg7[%c0_11, %c0_12], %20 {strides = array<i32>} : memref<16x384xf32, #tpu.memory_space<vmem>>, vector<16x384xf32>,
    %c1_i32 = arith.constant 1 : i32
    %c512_i32_13 = arith.constant 512 : i32
    %22 = arith.muli %c1_i32, %c512_i32_13 : i32
    %23 = tpu.assume_multiple %22, 512 : i32
    %c0_14 = arith.constant 0 : index
    %24 = arith.index_cast %23 : i32 to index
    %25 = vector.load %arg2[%c0_14, %24] : memref<384x1536xbf16, #tpu.memory_space<vmem>>, vector<384x512xbf16>
    %cst_15 = arith.constant dense<0.000000e+00> : vector<16x512xf32>
    %26 = tpu.matmul %1, %25, %cst_15 {dimension_numbers = #tpu.dot_dimension_numbers<[1], [0], [0], [1], [0, 0, 1, 1], [], []>} : vector<16x384xbf16>, vector<384x512xbf16>, vector<16x512xf32> -> vector<16x512xf32>
    %c0_16 = arith.constant 0 : index
    %27 = arith.index_cast %23 : i32 to index
    %28 = vector.load %arg3[%c0_16, %27] : memref<1x1536xf32, #tpu.memory_space<vmem>>, vector<1x512xf32>
    %29 = vector.broadcast %28 : vector<1x512xf32> to vector<16x512xf32>
    %30 = arith.addf %26, %29 : vector<16x512xf32>
    %cst_17 = arith.constant 0.000000e+00 : f32
    %31 = vector.broadcast %cst_17 : f32 to vector<16x512xf32>
    %32 = arith.maximumf %30, %31 : vector<16x512xf32>
    %c0_18 = arith.constant 0 : index
    %c0_19 = arith.constant 0 : index
    %33 = vector.load %arg7[%c0_18, %c0_19] : memref<16x384xf32, #tpu.memory_space<vmem>>, vector<16x384xf32>
    %34 = arith.truncf %32 : vector<16x512xf32> to vector<16x512xbf16>
    %35 = arith.index_cast %23 : i32 to index
    %c0_20 = arith.constant 0 : index
    %36 = vector.load %arg4[%35, %c0_20] : memref<1536x384xbf16, #tpu.memory_space<vmem>>, vector<512x384xbf16>
    %cst_21 = arith.constant dense<0.000000e+00> : vector<16x384xf32>
    %37 = tpu.matmul %34, %36, %cst_21 {dimension_numbers = #tpu.dot_dimension_numbers<[1], [0], [0], [1], [0, 0, 1, 1], [], []>} : vector<16x512xbf16>, vector<512x384xbf16>, vector<16x384xf32> -> vector<16x384xf32>
    %38 = arith.addf %33, %37 : vector<16x384xf32>
    %c0_22 = arith.constant 0 : index
    %c0_23 = arith.constant 0 : index
    %39 = vector.load %arg7[%c0_22, %c0_23] : memref<16x384xf32, #tpu.memory_space<vmem>>, vector<16x384xf32>
    tpu.vector_store %arg7[%c0_22, %c0_23], %38 {strides = array<i32>} : memref<16x384xf32, #tpu.memory_space<vmem>>, vector<16x384xf32>,
    %c2_i32 = arith.constant 2 : i32
    %c512_i32_24 = arith.constant 512 : i32
    %40 = arith.muli %c2_i32, %c512_i32_24 : i32
    %41 = tpu.assume_multiple %40, 512 : i32
    %c0_25 = arith.constant 0 : index
    %42 = arith.index_cast %41 : i32 to index
    %43 = vector.load %arg2[%c0_25, %42] : memref<384x1536xbf16, #tpu.memory_space<vmem>>, vector<384x512xbf16>
    %cst_26 = arith.constant dense<0.000000e+00> : vector<16x512xf32>
    %44 = tpu.matmul %1, %43, %cst_26 {dimension_numbers = #tpu.dot_dimension_numbers<[1], [0], [0], [1], [0, 0, 1, 1], [], []>} : vector<16x384xbf16>, vector<384x512xbf16>, vector<16x512xf32> -> vector<16x512xf32>
    %c0_27 = arith.constant 0 : index
    %45 = arith.index_cast %41 : i32 to index
    %46 = vector.load %arg3[%c0_27, %45] : memref<1x1536xf32, #tpu.memory_space<vmem>>, vector<1x512xf32>
    %47 = vector.broadcast %46 : vector<1x512xf32> to vector<16x512xf32>
    %48 = arith.addf %44, %47 : vector<16x512xf32>
    %cst_28 = arith.constant 0.000000e+00 : f32
    %49 = vector.broadcast %cst_28 : f32 to vector<16x512xf32>
    %50 = arith.maximumf %48, %49 : vector<16x512xf32>
    %c0_29 = arith.constant 0 : index
    %c0_30 = arith.constant 0 : index
    %51 = vector.load %arg7[%c0_29, %c0_30] : memref<16x384xf32, #tpu.memory_space<vmem>>, vector<16x384xf32>
    %52 = arith.truncf %50 : vector<16x512xf32> to vector<16x512xbf16>
    %53 = arith.index_cast %41 : i32 to index
    %c0_31 = arith.constant 0 : index
    %54 = vector.load %arg4[%53, %c0_31] : memref<1536x384xbf16, #tpu.memory_space<vmem>>, vector<512x384xbf16>
    %cst_32 = arith.constant dense<0.000000e+00> : vector<16x384xf32>
    %55 = tpu.matmul %52, %54, %cst_32 {dimension_numbers = #tpu.dot_dimension_numbers<[1], [0], [0], [1], [0, 0, 1, 1], [], []>} : vector<16x512xbf16>, vector<512x384xbf16>, vector<16x384xf32> -> vector<16x384xf32>
    %56 = arith.addf %51, %55 : vector<16x384xf32>
    %c0_33 = arith.constant 0 : index
    %c0_34 = arith.constant 0 : index
    %57 = vector.load %arg7[%c0_33, %c0_34] : memref<16x384xf32, #tpu.memory_space<vmem>>, vector<16x384xf32>
    tpu.vector_store %arg7[%c0_33, %c0_34], %56 {strides = array<i32>} : memref<16x384xf32, #tpu.memory_space<vmem>>, vector<16x384xf32>,
    %c3_i32 = arith.constant 3 : i32
    %c0_35 = arith.constant 0 : index
    %c0_36 = arith.constant 0 : index
    %58 = vector.load %arg7[%c0_35, %c0_36] : memref<16x384xf32, #tpu.memory_space<vmem>>, vector<16x384xf32>
    %c0_37 = arith.constant 0 : index
    %c0_38 = arith.constant 0 : index
    %59 = vector.load %arg5[%c0_37, %c0_38] : memref<1x384xf32, #tpu.memory_space<vmem>>, vector<1x384xf32>
    %60 = vector.broadcast %59 : vector<1x384xf32> to vector<16x384xf32>
    %61 = arith.addf %58, %60 : vector<16x384xf32>
    %c0_39 = arith.constant 0 : index
    %c0_40 = arith.constant 0 : index
    %62 = vector.load %arg6[%c0_39, %c0_40] : memref<16x384xf32, #tpu.memory_space<vmem>>, vector<16x384xf32>
    tpu.vector_store %arg6[%c0_39, %c0_40], %61 {strides = array<i32>} : memref<16x384xf32, #tpu.memory_space<vmem>>, vector<16x384xf32>,
    return
  }
  func.func @transform_0(%arg0: i32) -> (i32, i32) {
    %c0_i32 = arith.constant 0 : i32
    %c0_i32_0 = arith.constant 0 : i32
    return %arg0, %c0_i32 : i32, i32
  }
  func.func @transform_1(%arg0: i32) -> (i32, i32) {
    %c0_i32 = arith.constant 0 : i32
    %c0_i32_0 = arith.constant 0 : i32
    %c0_i32_1 = arith.constant 0 : i32
    return %c0_i32, %c0_i32_0 : i32, i32
  }
  func.func @transform_2(%arg0: i32) -> (i32, i32) {
    %c0_i32 = arith.constant 0 : i32
    %c0_i32_0 = arith.constant 0 : i32
    %c0_i32_1 = arith.constant 0 : i32
    return %c0_i32, %c0_i32_0 : i32, i32
  }
  func.func @transform_3(%arg0: i32) -> (i32, i32) {
    %c0_i32 = arith.constant 0 : i32
    %c0_i32_0 = arith.constant 0 : i32
    %c0_i32_1 = arith.constant 0 : i32
    return %c0_i32, %c0_i32_0 : i32, i32
  }
  func.func @transform_4(%arg0: i32) -> (i32, i32) {
    %c0_i32 = arith.constant 0 : i32
    %c0_i32_0 = arith.constant 0 : i32
    %c0_i32_1 = arith.constant 0 : i32
    return %c0_i32, %c0_i32_0 : i32, i32
  }
  func.func @transform_5(%arg0: i32) -> (i32, i32) {
    %c0_i32 = arith.constant 0 : i32
    %c0_i32_0 = arith.constant 0 : i32
    return %arg0, %c0_i32 : i32, i32
  }
}

</mosaic_0001>

<bundles_post_ra>
// kernel: tpu_custom_call.1
= control target key start
LH: loop header
LB: loop body
LE: loop exit
PB: predicated region body
PF: predicated region fallthrough
CT: control target
= control target key end

     0   :  { %10 = vsyncpa [#allocation4], 0  ;;  %s6945_s0 = inlined_call_operand.hbm [shape: f32[16,384], index: 0, kind: input, shape index: {}]   ;;  %s6946_s1 = inlined_call_operand.hbm [shape: bf16[384,1536], index: 1, kind: input, shape index: {}]   ;;  %s6947_s2 = inlined_call_operand.hbm [shape: f32[1,1536], index: 2, kind: input, shape index: {}]   ;;  %s6948_s3 = inlined_call_operand.hbm [shape: bf16[1536,384], index: 3, kind: input, shape index: {}]   ;;  %s6949_s4 = inlined_call_operand.hbm [shape: f32[1,384], index: 4, kind: input, shape index: {}]   ;;  %s6950_s5 = inlined_call_operand.hbm [shape: f32[16,384], index: 5, kind: output, shape index: {}]  }
   0x1   :  { %11 = vsyncpa [#allocation7], 0 }
   0x2   :  { %12 = vsyncpa [#allocation10], 0 }
   0x3   :  { %13 = vsyncpa [#allocation5], 0  ;;  %s6739_s18 = smov [#allocation6]   ;;  %s6599_s22 = scalar_lea.hbm %s6946_s1, 36864 }
   0x4   :  { %s31_s19 = sshll.u32 %s6739_s18, 4  ;;  %p6600_p0 = scmp.ne.s32.totalorder %s6946_s1, %s6599_s22  ;;  %s32_s19 = int_to_ptr.vmem [resolvable:$true] %s31_s19 }
   0x5   :  { %p6603_p1 = scmp.lt.u32.totalorder %s6599_s22, %s6946_s1 }
   0x7   :  { %p6605_p2 = pnand %p6603_p1, %p6600_p0 }
   0x9   :  { %6608 = shalt.err (!%p6605_p2)
}
   0xa   :  { %s6609_s27 = scalar_lea.vmem %s32_s19, 36864  ;;  %p6614_p4 = scmp.lt.s32.totalorder %s32_s19, %s32_s19 }
   0xb   :  { %p6610_p3 = scmp.ne.s32.totalorder %s32_s19, %s6609_s27  ;;  %p6615_p5 = scmp.lt.s32.totalorder %s6609_s27, %s6609_s27 }
   0xd   :  { %p6616_p6 = por %p6615_p5, %p6614_p4 }
   0xf   :  { %p6617_p7 = pnand %p6616_p6, %p6610_p3 }
  0x11   :  { %6620 = shalt.err (!%p6617_p7)
}
  0x12   :  { %s6740_s28 = smov 768   ;;  %s6741_s29 = smov 48  }
  0x13   :  { %37 = dma.hbm_to_vmem [thread:$0]  %s6946_s1, 36864, %s32_s19, [#allocation7], %s6740_s28, %s6740_s28, %s6741_s29  }
  0x14   :  { %s6742_s7 = smov [#allocation9]   ;;  %s6621_s11 = scalar_lea.hbm %s6948_s3, 36864 }
  0x15   :  { %s53_s8 = sshll.u32 %s6742_s7, 4  ;;  %p6622_p8 = scmp.ne.s32.totalorder %s6948_s3, %s6621_s11  ;;  %s54_s8 = int_to_ptr.vmem [resolvable:$true] %s53_s8 }
  0x16   :  { %p6625_p9 = scmp.lt.u32.totalorder %s6621_s11, %s6948_s3 }
  0x18   :  { %p6627_p10 = pnand %p6625_p9, %p6622_p8 }
  0x1a   :  { %6630 = shalt.err (!%p6627_p10)
}
  0x1b   :  { %s6631_s16 = scalar_lea.vmem %s54_s8, 36864  ;;  %p6636_p12 = scmp.lt.s32.totalorder %s54_s8, %s54_s8 }
  0x1c   :  { %p6632_p11 = scmp.ne.s32.totalorder %s54_s8, %s6631_s16  ;;  %p6637_p13 = scmp.lt.s32.totalorder %s6631_s16, %s6631_s16 }
  0x1e   :  { %p6638_p0 = por %p6637_p13, %p6636_p12 }
  0x20   :  { %p6639_p1 = pnand %p6638_p0, %p6632_p11 }
  0x22   :  { %6642 = shalt.err (!%p6639_p1)
}
  0x23   :  { %s6743_s1 = smov 192   ;;  %s6744_s17 = smov 12  }
  0x24   :  { %59 = dma.hbm_to_vmem [thread:$0]  %s6948_s3, 36864, %s54_s8, [#allocation10], %s6743_s1, %s6743_s1, %s6744_s17  }
  0x25   :  { %s6745_s20 = smov [#allocation3]   ;;  %s6643_s24 = scalar_lea.hbm %s6945_s0, 768 }
  0x26   :  { %s19_s21 = sshll.u32 %s6745_s20, 4  ;;  %p6644_p2 = scmp.ne.s32.totalorder %s6945_s0, %s6643_s24  ;;  %s20_s21 = int_to_ptr.vmem [resolvable:$true] %s19_s21 }
  0x27   :  { %p6647_p3 = scmp.lt.u32.totalorder %s6643_s24, %s6945_s0 }
  0x29   :  { %p6649_p4 = pnand %p6647_p3, %p6644_p2 }
  0x2b   :  { %6652 = shalt.err (!%p6649_p4)
}
  0x2c   :  { %s6653_s29 = scalar_lea.vmem %s20_s21, 768  ;;  %p6658_p6 = scmp.lt.s32.totalorder %s20_s21, %s20_s21 }
  0x2d   :  { %p6654_p5 = scmp.ne.s32.totalorder %s20_s21, %s6653_s29  ;;  %p6659_p7 = scmp.lt.s32.totalorder %s6653_s29, %s6653_s29 }
  0x2f   :  { %p6660_p8 = por %p6659_p7, %p6658_p6 }
  0x31   :  { %p6661_p9 = pnand %p6660_p8, %p6654_p5 }
  0x33   :  { %6664 = shalt.err (!%p6661_p9)
}
  0x34   :  { %s6746_s3 = smov 384   ;;  %s6747_s30 = smov 24  }
  0x35   :  { %25 = dma.hbm_to_vmem [thread:$0]  %s6945_s0, 768, %s20_s21, [#allocation4], %s6746_s3, %s6746_s3, %s6747_s30  }
  0x36   :  { %s6748_s8 = smov [#allocation8]   ;;  %s6749_s10 = smov [#allocation11]  }
  0x37   :  { %s44_s9 = sshll.u32 %s6748_s8, 4  ;;  %s66_s11 = sshll.u32 %s6749_s10, 4  ;;  %s45_s9 = int_to_ptr.vmem [resolvable:$true] %s44_s9  ;;  %s67_s11 = int_to_ptr.vmem [resolvable:$true] %s66_s11 }
  0x38   :  { %s6665_s14 = scalar_lea.hbm %s6947_s2, 192 }
  0x39   :  { %p6666_p10 = scmp.ne.s32.totalorder %s6947_s2, %s6665_s14  ;;  %p6669_p11 = scmp.lt.u32.totalorder %s6665_s14, %s6947_s2 }
  0x3b   :  { %p6671_p12 = pnand %p6669_p11, %p6666_p10 }
  0x3d   :  { %6674 = shalt.err (!%p6671_p12)
}
  0x3e   :  { %s6675_s0 = scalar_lea.vmem %s45_s9, 192  ;;  %p6680_p0 = scmp.lt.s32.totalorder %s45_s9, %s45_s9 }
  0x3f   :  { %p6676_p13 = scmp.ne.s32.totalorder %s45_s9, %s6675_s0  ;;  %p6681_p1 = scmp.lt.s32.totalorder %s6675_s0, %s6675_s0 }
  0x41   :  { %p6682_p2 = por %p6681_p1, %p6680_p0 }
  0x43   :  { %p6683_p3 = pnand %p6682_p2, %p6676_p13 }
  0x45   :  { %6686 = shalt.err (!%p6683_p3)
}
  0x46   :  { %47 = dma.hbm_to_vmem [thread:$0]  %s6947_s2, 192, %s45_s9, [#allocation7]  }
  0x47   :  { %s6687_s22 = scalar_lea.hbm %s6949_s4, 48 }
  0x48   :  { %p6688_p4 = scmp.ne.s32.totalorder %s6949_s4, %s6687_s22  ;;  %p6691_p5 = scmp.lt.u32.totalorder %s6687_s22, %s6949_s4 }
  0x4a   :  { %p6693_p6 = pnand %p6691_p5, %p6688_p4 }
  0x4c   :  { %6696 = shalt.err (!%p6693_p6)
}
  0x4d   :  { %s6697_s27 = scalar_lea.vmem %s67_s11, 48  ;;  %s6701_s28 = scalar_lea.vmem %s67_s11, 64 }
  0x4e   :  { %p6698_p7 = scmp.ne.s32.totalorder %s67_s11, %s6697_s27  ;;  %p6702_p8 = scmp.lt.s32.totalorder %s67_s11, %s67_s11 }
  0x4f   :  { %p6703_p9 = scmp.lt.s32.totalorder %s6701_s28, %s6697_s27 }
  0x51   :  { %p6704_p10 = por %p6703_p9, %p6702_p8 }
  0x53   :  { %p6705_p11 = pnand %p6704_p10, %p6698_p7 }
  0x55   :  { %6708 = shalt.err (!%p6705_p11)
}
  0x56   :  { %69 = dma.hbm_to_vmem [thread:$0]  %s6949_s4, 48, %s67_s11, [#allocation10]  }
  0x57   :  { %6731 = dma.done.wait [#allocation4], 768  }
  0x58   :  { %6732 = vsyncadd [#allocation4], 4294966528 }
  0x59   :  { %6733 = dma.done.wait [#allocation7], 37056  }
  0x5a   :  { %6734 = vsyncadd [#allocation7], 4294930240 }
  0x5b   :  { %6735 = dma.done.wait [#allocation10], 36912  }
  0x5c   :  { %6736 = vsyncadd [#allocation10], 4294930384  ;;  %v5783_v0 = vld [vmem:[#allocation6 + $0x4] ss:$48 sps:$4 sm:$0xff]   ;;  %v5785_v1 = vld [vmem:[#allocation6 + $0xc] ss:$48 sps:$4 sm:$0xff]  }
  0x5d   :  { %699 = vmatprep.subr.bf16.mxu0 %v5783_v0  ;;  %v5787_v2 = vld [vmem:[#allocation6] ss:$48 sps:$4 sm:$0xff]   ;;  %v5788_v3 = vld [vmem:[#allocation6 + $0x8] ss:$48 sps:$4 sm:$0xff]   ;;  %785 = vmatprep.subr.bf16.mxu1 %v5785_v1  ;;  %v5789_v4 = vld [vmem:[#allocation6 + $0x64] ss:$48 sps:$4 sm:$0xff]  }
  0x5e   :  { %700 = vmatpush1.bf16.msra.mxu0 %v5787_v2  ;;  %786 = vmatpush1.bf16.msra.mxu1 %v5788_v3  ;;  %v5791_v5 = vld [vmem:[#allocation6 + $0x6c] ss:$48 sps:$4 sm:$0xff]   ;;  %v5793_v6 = vld [vmem:[#allocation6 + $0x60] ss:$48 sps:$4 sm:$0xff]   ;;  %v5794_v7 = vld [vmem:[#allocation6 + $0x68] ss:$48 sps:$4 sm:$0xff]  }
  0x5f   :  { %701 = vmatprep.subr.bf16.mxu0 %v5789_v4  ;;  %787 = vmatprep.subr.bf16.mxu1 %v5791_v5  ;;  %v5795_v8 = vld [vmem:[#allocation6 + $0xc4] ss:$48 sps:$4 sm:$0xff]   ;;  %v5797_v9 = vld [vmem:[#allocation6 + $0xcc] ss:$48 sps:$4 sm:$0xff]   ;;  %v5799_v10 = vld [vmem:[#allocation6 + $0xc0] ss:$48 sps:$4 sm:$0xff]  }
  0x60   :  { %v5800_v11 = vld [vmem:[#allocation6 + $0xc8] ss:$48 sps:$4 sm:$0xff]   ;;  %v5801_v12 = vld [vmem:[#allocation6 + $0x124] ss:$48 sps:$4 sm:$0xff]   ;;  %v5803_v13 = vld [vmem:[#allocation6 + $0x12c] ss:$48 sps:$4 sm:$0xff]  }
  0x61   :  { %v5805_v14 = vld [vmem:[#allocation6 + $0x120] ss:$48 sps:$4 sm:$0xff]   ;;  %v5806_v15 = vld [vmem:[#allocation6 + $0x128] ss:$48 sps:$4 sm:$0xff]   ;;  %v5807_v16 = vld [vmem:[#allocation6 + $0x184] ss:$48 sps:$4 sm:$0xff]  }
  0x62   :  { %702 = vmatpush1.bf16.msra.mxu0 %v5793_v6  ;;  %788 = vmatpush1.bf16.msra.mxu1 %v5794_v7  ;;  %v5809_v17 = vld [vmem:[#allocation6 + $0x18c] ss:$48 sps:$4 sm:$0xff]   ;;  %v5811_v18 = vld [vmem:[#allocation6 + $0x180] ss:$48 sps:$4 sm:$0xff]   ;;  %v5812_v19 = vld [vmem:[#allocation6 + $0x188] ss:$48 sps:$4 sm:$0xff]  }
  0x63   :  { %703 = vmatprep.subr.bf16.mxu0 %v5795_v8  ;;  %789 = vmatprep.subr.bf16.mxu1 %v5797_v9  ;;  %v5813_v20 = vld [vmem:[#allocation6 + $0x1e4] ss:$48 sps:$4 sm:$0xff]   ;;  %v5815_v21 = vld [vmem:[#allocation6 + $0x1ec] ss:$48 sps:$4 sm:$0xff]   ;;  %v5817_v22 = vld [vmem:[#allocation6 + $0x1e0] ss:$48 sps:$4 sm:$0xff]  }
  0x64   :  { %v5818_v23 = vld [vmem:[#allocation6 + $0x1e8] ss:$48 sps:$4 sm:$0xff]   ;;  %v5819_v24 = vld [vmem:[#allocation6 + $0x244] ss:$48 sps:$4 sm:$0xff]   ;;  %v5821_v25 = vld [vmem:[#allocation6 + $0x24c] ss:$48 sps:$4 sm:$0xff]  }
  0x65   :  { %v5823_v26 = vld [vmem:[#allocation6 + $0x240] ss:$48 sps:$4 sm:$0xff]   ;;  %v5824_v27 = vld [vmem:[#allocation6 + $0x248] ss:$48 sps:$4 sm:$0xff]   ;;  %v5825_v28 = vld [vmem:[#allocation6 + $0x2a4] ss:$48 sps:$4 sm:$0xff]  }
  0x66   :  { %704 = vmatpush1.bf16.msra.mxu0 %v5799_v10  ;;  %790 = vmatpush1.bf16.msra.mxu1 %v5800_v11  ;;  %v5827_v29 = vld [vmem:[#allocation6 + $0x2ac] ss:$48 sps:$4 sm:$0xff]   ;;  %v5829_v30 = vld [vmem:[#allocation6 + $0x2a0] ss:$48 sps:$4 sm:$0xff]   ;;  %v5830_v31 = vld [vmem:[#allocation6 + $0x2a8] ss:$48 sps:$4 sm:$0xff]  }
  0x67   :  { %705 = vmatprep.subr.bf16.mxu0 %v5801_v12  ;;  %791 = vmatprep.subr.bf16.mxu1 %v5803_v13  ;;  %v5831_v32 = vld [vmem:[#allocation6 + $0x304] ss:$48 sps:$4 sm:$0xff]   ;;  %v5833_v33 = vld [vmem:[#allocation6 + $0x30c] ss:$48 sps:$4 sm:$0xff]   ;;  %v5835_v34 = vld [vmem:[#allocation6 + $0x300] ss:$48 sps:$4 sm:$0xff]  }
  0x68   :  { %v5836_v35 = vld [vmem:[#allocation6 + $0x308] ss:$48 sps:$4 sm:$0xff]   ;;  %v5837_v36 = vld [vmem:[#allocation6 + $0x364] ss:$48 sps:$4 sm:$0xff]   ;;  %v5839_v37 = vld [vmem:[#allocation6 + $0x36c] ss:$48 sps:$4 sm:$0xff]  }
  0x69   :  { %v5841_v38 = vld [vmem:[#allocation6 + $0x360] ss:$48 sps:$4 sm:$0xff]   ;;  %v5842_v39 = vld [vmem:[#allocation6 + $0x368] ss:$48 sps:$4 sm:$0xff]   ;;  %v5843_v40 = vld [vmem:[#allocation6 + $0x3c4] ss:$48 sps:$4 sm:$0xff]  }
  0x6a   :  { %706 = vmatpush1.bf16.msra.mxu0 %v5805_v14  ;;  %792 = vmatpush1.bf16.msra.mxu1 %v5806_v15  ;;  %v5845_v41 = vld [vmem:[#allocation6 + $0x3cc] ss:$48 sps:$4 sm:$0xff]   ;;  %v5847_v42 = vld [vmem:[#allocation6 + $0x3c0] ss:$48 sps:$4 sm:$0xff]   ;;  %v5848_v43 = vld [vmem:[#allocation6 + $0x3c8] ss:$48 sps:$4 sm:$0xff]  }
  0x6b   :  { %707 = vmatprep.subr.bf16.mxu0 %v5807_v16  ;;  %793 = vmatprep.subr.bf16.mxu1 %v5809_v17  ;;  %v5849_v44 = vld [vmem:[#allocation6 + $0x424] ss:$48 sps:$4 sm:$0xff]   ;;  %v5851_v45 = vld [vmem:[#allocation6 + $0x42c] ss:$48 sps:$4 sm:$0xff]   ;;  %v5853_v48 = vld [vmem:[#allocation6 + $0x420] ss:$48 sps:$4 sm:$0xff]  }
  0x6c   :  { %v87_v46 = vld [vmem:[#allocation3 + $0x8] sm:$0xff]  ;;  %v90_v47 = vld [vmem:[#allocation3 + $0x20] sm:$0xff]  ;;  %v89_v5 = vld [vmem:[#allocation3 + $0x18] sm:$0xff]  ;;  %v6750_v16 = vmov 0   ;;  %s6751_s4 = smov [#allocation12]  }
  0x6d   :  { %v5854_v49 = vld [vmem:[#allocation6 + $0x428] ss:$48 sps:$4 sm:$0xff]   ;;  %v6845_v50 = vpack.c.bf16 %v90_v47, %v87_v46  ;;  %v5855_v51 = vld [vmem:[#allocation6 + $0x484] ss:$48 sps:$4 sm:$0xff]   ;;  %v5857_v52 = vld [vmem:[#allocation6 + $0x48c] ss:$48 sps:$4 sm:$0xff]  }
  0x6e   :  { %708 = vmatpush1.bf16.msra.mxu0 %v5811_v18  ;;  %794 = vmatpush1.bf16.msra.mxu1 %v5812_v19  ;;  %v5859_v53 = vld [vmem:[#allocation6 + $0x480] ss:$48 sps:$4 sm:$0xff]   ;;  %v5860_v54 = vld [vmem:[#allocation6 + $0x488] ss:$48 sps:$4 sm:$0xff]   ;;  %v5861_v55 = vld [vmem:[#allocation6 + $0x4e4] ss:$48 sps:$4 sm:$0xff]  }
  0x6f   :  { %709 = vmatprep.subr.bf16.mxu0 %v5813_v20  ;;  %795 = vmatprep.subr.bf16.mxu1 %v5815_v21  ;;  %v5863_v56 = vld [vmem:[#allocation6 + $0x4ec] ss:$48 sps:$4 sm:$0xff]   ;;  %v5865_v57 = vld [vmem:[#allocation6 + $0x4e0] ss:$48 sps:$4 sm:$0xff]   ;;  %v5866_v58 = vld [vmem:[#allocation6 + $0x4e8] ss:$48 sps:$4 sm:$0xff]  }
  0x70   :  { %731 = vmatprep.mubr.bf16.mxu0 %v6845_v50  ;;  %817 = vmatprep.mubr.bf16.mxu1 %v6845_v50  ;;  %v5867_v59 = vld [vmem:[#allocation6 + $0x544] ss:$48 sps:$4 sm:$0xff]   ;;  %v5869_v60 = vld [vmem:[#allocation6 + $0x54c] ss:$48 sps:$4 sm:$0xff]   ;;  %v5871_v61 = vld [vmem:[#allocation6 + $0x540] ss:$48 sps:$4 sm:$0xff]  }
  0x71   :  { %v5872_v62 = vld [vmem:[#allocation6 + $0x548] ss:$48 sps:$4 sm:$0xff]   ;;  %v5873_v63 = vld [vmem:[#allocation6 + $0x5a4] ss:$48 sps:$4 sm:$0xff]   ;;  %v5875_v0 = vld [vmem:[#allocation6 + $0x5ac] ss:$48 sps:$4 sm:$0xff]  }
  0x72   :  { %710 = vmatpush1.bf16.msra.mxu0 %v5817_v22  ;;  %796 = vmatpush1.bf16.msra.mxu1 %v5818_v23  ;;  %v5877_v1 = vld [vmem:[#allocation6 + $0x5a0] ss:$48 sps:$4 sm:$0xff]   ;;  %v5878_v2 = vld [vmem:[#allocation6 + $0x5a8] ss:$48 sps:$4 sm:$0xff]   ;;  %v5881_v3 = vld [vmem:[#allocation6 + $0x604] ss:$48 sps:$4 sm:$0xff]  }
  0x73   :  { %711 = vmatprep.subr.bf16.mxu0 %v5819_v24  ;;  %797 = vmatprep.subr.bf16.mxu1 %v5821_v25  ;;  %v86_v4 = vld [vmem:[#allocation3] sm:$0xff]  ;;  %v5884_v6 = vld [vmem:[#allocation6 + $0x60c] ss:$48 sps:$4 sm:$0xff]   ;;  %v5882_v9 = vld [vmem:[#allocation6 + $0x608] ss:$48 sps:$4 sm:$0xff]   ;;  %s4978_s6 = sshll.u32 %s6751_s4, 4  ;;  %s4979_s6 = int_to_ptr.vmem [resolvable:$true] %s4978_s6 }
  0x74   :  { %v5879_v7 = vld [vmem:[#allocation6 + $0x600] ss:$48 sps:$4 sm:$0xff]   ;;  %v6849_v8 = vpack.c.bf16 %v89_v5, %v86_v4  ;;  %v5887_v10 = vld [vmem:[#allocation6 + $0x664] ss:$48 sps:$4 sm:$0xff]   ;;  %v5890_v11 = vld [vmem:[#allocation6 + $0x66c] ss:$48 sps:$4 sm:$0xff]   ;;  %p6714_p13 = scmp.lt.s32.totalorder %s4979_s6, %s4979_s6 }
  0x75   :  { %v5885_v12 = vld [vmem:[#allocation6 + $0x660] ss:$48 sps:$4 sm:$0xff]   ;;  %v5888_v13 = vld [vmem:[#allocation6 + $0x668] ss:$48 sps:$4 sm:$0xff]   ;;  %v5893_v14 = vld [vmem:[#allocation6 + $0x6c4] ss:$48 sps:$4 sm:$0xff]  }
  0x76   :  { %712 = vmatpush1.bf16.msra.mxu0 %v5823_v26  ;;  %798 = vmatpush1.bf16.msra.mxu1 %v5824_v27  ;;  %v5896_v15 = vld [vmem:[#allocation6 + $0x6cc] ss:$48 sps:$4 sm:$0xff]   ;;  %v5891_v17 = vld [vmem:[#allocation6 + $0x6c0] ss:$48 sps:$4 sm:$0xff]   ;;  %v5894_v18 = vld [vmem:[#allocation6 + $0x6c8] ss:$48 sps:$4 sm:$0xff]  }
  0x77   :  { %713 = vmatprep.subr.bf16.mxu0 %v5825_v28  ;;  %799 = vmatprep.subr.bf16.mxu1 %v5827_v29  ;;  %v5899_v19 = vld [vmem:[#allocation6 + $0x724] ss:$48 sps:$4 sm:$0xff]   ;;  %v5902_v20 = vld [vmem:[#allocation6 + $0x72c] ss:$48 sps:$4 sm:$0xff]   ;;  %v5897_v21 = vld [vmem:[#allocation6 + $0x720] ss:$48 sps:$4 sm:$0xff]  }
  0x78   :  { %v5900_v22 = vld [vmem:[#allocation6 + $0x728] ss:$48 sps:$4 sm:$0xff]   ;;  %v5905_v23 = vld [vmem:[#allocation6 + $0x784] ss:$48 sps:$4 sm:$0xff]   ;;  %v5908_v24 = vld [vmem:[#allocation6 + $0x78c] ss:$48 sps:$4 sm:$0xff]  }
  0x79   :  { %v5903_v25 = vld [vmem:[#allocation6 + $0x780] ss:$48 sps:$4 sm:$0xff]   ;;  %v5906_v26 = vld [vmem:[#allocation6 + $0x788] ss:$48 sps:$4 sm:$0xff]   ;;  %v5911_v27 = vld [vmem:[#allocation6 + $0x7e4] ss:$48 sps:$4 sm:$0xff]  }
  0x7a   :  { %714 = vmatpush1.bf16.msra.mxu0 %v5829_v30  ;;  %800 = vmatpush1.bf16.msra.mxu1 %v5830_v31  ;;  %v5914_v28 = vld [vmem:[#allocation6 + $0x7ec] ss:$48 sps:$4 sm:$0xff]   ;;  %v5909_v29 = vld [vmem:[#allocation6 + $0x7e0] ss:$48 sps:$4 sm:$0xff]   ;;  %v5912_v30 = vld [vmem:[#allocation6 + $0x7e8] ss:$48 sps:$4 sm:$0xff]  }
  0x7b   :  { %715 = vmatprep.subr.bf16.mxu0 %v5831_v32  ;;  %801 = vmatprep.subr.bf16.mxu1 %v5833_v33  ;;  %v5917_v31 = vld [vmem:[#allocation6 + $0x844] ss:$48 sps:$4 sm:$0xff]   ;;  %v5920_v32 = vld [vmem:[#allocation6 + $0x84c] ss:$48 sps:$4 sm:$0xff]   ;;  %v5915_v33 = vld [vmem:[#allocation6 + $0x840] ss:$48 sps:$4 sm:$0xff]  }
  0x7c   :  { %v5955_v46 = vld [vmem:[#allocation9 + $0x8] ss:$12 sps:$4 sm:$0xff]   ;;  %v5959_v47 = vld [vmem:[#allocation9 + $0xe0] ss:$12 sps:$4 sm:$0xff]   ;;  %v5945_v4 = vld [vmem:[#allocation9 + $0x90] ss:$12 sps:$4 sm:$0xff]  }
  0x7d   :  { %v5950_v5 = vld [vmem:[#allocation9 + $0xac] ss:$12 sps:$4 sm:$0xff]   ;;  %s6709_s7 = scalar_lea.vmem %s4979_s6, 768 }
  0x7e   :  { %716 = vmatpush1.bf16.msra.mxu0 %v5835_v34  ;;  %802 = vmatpush1.bf16.msra.mxu1 %v5836_v35  ;;  %v5918_v34 = vld [vmem:[#allocation6 + $0x848] ss:$48 sps:$4 sm:$0xff]   ;;  %v5923_v35 = vld [vmem:[#allocation6 + $0x8a4] ss:$48 sps:$4 sm:$0xff]   ;;  %p6710_p12 = scmp.ne.s32.totalorder %s4979_s6, %s6709_s7  ;;  %p6715_p0 = scmp.lt.s32.totalorder %s6709_s7, %s6709_s7 }
  0x7f   :  { %717 = vmatprep.subr.bf16.mxu0 %v5837_v36  ;;  %803 = vmatprep.subr.bf16.mxu1 %v5839_v37  ;;  %v5926_v36 = vld [vmem:[#allocation6 + $0x8ac] ss:$48 sps:$4 sm:$0xff]   ;;  %v5921_v37 = vld [vmem:[#allocation6 + $0x8a0] ss:$48 sps:$4 sm:$0xff]  }
  0x80   :  { %p6716_p1 = por %p6715_p0, %p6714_p13 }
  0x82   :  { %718 = vmatpush1.bf16.msra.mxu0 %v5841_v38  ;;  %804 = vmatpush1.bf16.msra.mxu1 %v5842_v39  ;;  %v5924_v38 = vld [vmem:[#allocation6 + $0x8a8] ss:$48 sps:$4 sm:$0xff]   ;;  %v88_v39 = vld [vmem:[#allocation3 + $0x10] sm:$0xff]  ;;  %p6717_p2 = pnand %p6716_p1, %p6710_p12 }
  0x83   :  { %719 = vmatprep.subr.bf16.mxu0 %v5843_v40  ;;  %805 = vmatprep.subr.bf16.mxu1 %v5845_v41  ;;  %v91_v40 = vld [vmem:[#allocation3 + $0x28] sm:$0xff] }
  0x84   :  { %v5929_v41 = vld [vmem:[#allocation9 + $0x4] ss:$12 sps:$4 sm:$0xff]  }
  0x86   :  { %720 = vmatpush1.bf16.msra.mxu0 %v5847_v42  ;;  %806 = vmatpush1.bf16.msra.mxu1 %v5848_v43  ;;  %v5954_v42 = vld [vmem:[#allocation9 + $0xc8] ss:$12 sps:$4 sm:$0xff]   ;;  %v5927_v43 = vld [vmem:[#allocation9] ss:$12 sps:$4 sm:$0xff]  }
  0x87   :  { %721 = vmatprep.subr.bf16.mxu0 %v5849_v44  ;;  %807 = vmatprep.subr.bf16.mxu1 %v5851_v45  ;;  %v6855_v44 = vpack.c.bf16 %v91_v40, %v88_v39  ;;  %v5932_v45 = vld [vmem:[#allocation9 + $0x1c] ss:$12 sps:$4 sm:$0xff]  }
  0x8a   :  { %722 = vmatpush1.bf16.msra.mxu0 %v5853_v48  ;;  %808 = vmatpush1.bf16.msra.mxu1 %v5854_v49  ;;  %v5930_v48 = vld [vmem:[#allocation9 + $0x18] ss:$12 sps:$4 sm:$0xff]   ;;  %v5960_v49 = vld [vmem:[#allocation9 + $0x20] ss:$12 sps:$4 sm:$0xff]  }
  0x8b   :  { %723 = vmatprep.subr.bf16.mxu0 %v5855_v51  ;;  %809 = vmatprep.subr.bf16.mxu1 %v5857_v52  ;;  %v5935_v51 = vld [vmem:[#allocation9 + $0x34] ss:$12 sps:$4 sm:$0xff]   ;;  %v5964_v52 = vld [vmem:[#allocation9 + $0xf8] ss:$12 sps:$4 sm:$0xff]  }
  0x8e   :  { %724 = vmatpush1.bf16.msra.mxu0 %v5859_v53  ;;  %810 = vmatpush1.bf16.msra.mxu1 %v5860_v54  ;;  %v5933_v53 = vld [vmem:[#allocation9 + $0x30] ss:$12 sps:$4 sm:$0xff]   ;;  %v5965_v54 = vld [vmem:[#allocation9 + $0x38] ss:$12 sps:$4 sm:$0xff]  }
  0x8f   :  { %725 = vmatprep.subr.bf16.mxu0 %v5861_v55  ;;  %811 = vmatprep.subr.bf16.mxu1 %v5863_v56  ;;  %v5938_v55 = vld [vmem:[#allocation9 + $0x4c] ss:$12 sps:$4 sm:$0xff]   ;;  %v5969_v56 = vld [vmem:[#allocation9 + $0x110] ss:$12 sps:$4 sm:$0xff]  }
  0x92   :  { %726 = vmatpush1.bf16.msra.mxu0 %v5865_v57  ;;  %812 = vmatpush1.bf16.msra.mxu1 %v5866_v58  ;;  %v5936_v57 = vld [vmem:[#allocation9 + $0x48] ss:$12 sps:$4 sm:$0xff]   ;;  %v5970_v58 = vld [vmem:[#allocation9 + $0x50] ss:$12 sps:$4 sm:$0xff]  }
  0x93   :  { %727 = vmatprep.subr.bf16.mxu0 %v5867_v59  ;;  %813 = vmatprep.subr.bf16.mxu1 %v5869_v60  ;;  %v5941_v59 = vld [vmem:[#allocation9 + $0x64] ss:$12 sps:$4 sm:$0xff]   ;;  %v5974_v60 = vld [vmem:[#allocation9 + $0x128] ss:$12 sps:$4 sm:$0xff]  }
  0x96   :  { %728 = vmatpush1.bf16.msra.mxu0 %v5871_v61  ;;  %814 = vmatpush1.bf16.msra.mxu1 %v5872_v62  ;;  %v5939_v61 = vld [vmem:[#allocation9 + $0x60] ss:$12 sps:$4 sm:$0xff]   ;;  %v5975_v62 = vld [vmem:[#allocation9 + $0x68] ss:$12 sps:$4 sm:$0xff]  }
  0x97   :  { %729 = vmatprep.subr.bf16.mxu0 %v5873_v63  ;;  %815 = vmatprep.subr.bf16.mxu1 %v5875_v0  ;;  %v5944_v63 = vld [vmem:[#allocation9 + $0x7c] ss:$12 sps:$4 sm:$0xff]   ;;  %v5979_v0 = vld [vmem:[#allocation9 + $0x140] ss:$12 sps:$4 sm:$0xff]  }
  0x9a   :  { %730 = vmatpush1.bf16.msra.mxu0 %v5877_v1  ;;  %816 = vmatpush1.bf16.msra.mxu1 %v5878_v2  ;;  %v5942_v1 = vld [vmem:[#allocation9 + $0x78] ss:$12 sps:$4 sm:$0xff]   ;;  %v5980_v2 = vld [vmem:[#allocation9 + $0x80] ss:$12 sps:$4 sm:$0xff]  }
  0x9b   :  { %742 = vmatprep.subr.bf16.mxu0 %v5881_v3  ;;  %828 = vmatprep.subr.bf16.mxu1 %v5884_v6  ;;  %v5947_v3 = vld [vmem:[#allocation9 + $0x94] ss:$12 sps:$4 sm:$0xff]  }
  0x9c   :  { %v5948_v6 = vld [vmem:[#allocation9 + $0xa8] ss:$12 sps:$4 sm:$0xff]  }
  0x9d   :  { %732 = vmatmul.mubr.bf16.vlgmr.msra.gmra.mrb[0].mxu0 %v6849_v8  ;;  %818 = vmatmul.mubr.bf16.vlgmr.msra.gmra.mrb[0].mxu1 %v6849_v8 }
  0x9e   :  { %743 = vmatpush1.bf16.msra.mxu0 %v5879_v7  ;;  %829 = vmatpush1.bf16.msra.mxu1 %v5882_v9  ;;  %v5953_v7 = vld [vmem:[#allocation9 + $0xc4] ss:$12 sps:$4 sm:$0xff]   ;;  %v5951_v9 = vld [vmem:[#allocation9 + $0xc0] ss:$12 sps:$4 sm:$0xff]  }
  0x9f   :  { %744 = vmatprep.subr.bf16.mxu0 %v5887_v10  ;;  %830 = vmatprep.subr.bf16.mxu1 %v5890_v11  ;;  %v5958_v10 = vld [vmem:[#allocation9 + $0xdc] ss:$12 sps:$4 sm:$0xff]   ;;  %v5956_v11 = vld [vmem:[#allocation9 + $0xd8] ss:$12 sps:$4 sm:$0xff]  }
  0xa0   :  { %774 = vmatprep.mubr.bf16.mxu0 %v6750_v16  ;;  %860 = vmatprep.mubr.bf16.mxu1 %v6750_v16 }
  0xa2   :  { %745 = vmatpush1.bf16.msra.mxu0 %v5885_v12  ;;  %831 = vmatpush1.bf16.msra.mxu1 %v5888_v13  ;;  %v5963_v12 = vld [vmem:[#allocation9 + $0xf4] ss:$12 sps:$4 sm:$0xff]   ;;  %v5961_v13 = vld [vmem:[#allocation9 + $0xf0] ss:$12 sps:$4 sm:$0xff]  }
  0xa3   :  { %746 = vmatprep.subr.bf16.mxu0 %v5893_v14  ;;  %832 = vmatprep.subr.bf16.mxu1 %v5896_v15  ;;  %v5968_v14 = vld [vmem:[#allocation9 + $0x10c] ss:$12 sps:$4 sm:$0xff]   ;;  %v5966_v15 = vld [vmem:[#allocation9 + $0x108] ss:$12 sps:$4 sm:$0xff]  }
  0xa6   :  { %747 = vmatpush1.bf16.msra.mxu0 %v5891_v17  ;;  %833 = vmatpush1.bf16.msra.mxu1 %v5894_v18  ;;  %v5973_v17 = vld [vmem:[#allocation9 + $0x124] ss:$12 sps:$4 sm:$0xff]   ;;  %v5971_v18 = vld [vmem:[#allocation9 + $0x120] ss:$12 sps:$4 sm:$0xff]  }
  0xa7   :  { %748 = vmatprep.subr.bf16.mxu0 %v5899_v19  ;;  %834 = vmatprep.subr.bf16.mxu1 %v5902_v20  ;;  %v5978_v19 = vld [vmem:[#allocation9 + $0x13c] ss:$12 sps:$4 sm:$0xff]   ;;  %v5976_v20 = vld [vmem:[#allocation9 + $0x138] ss:$12 sps:$4 sm:$0xff]  }
  0xaa   :  { %749 = vmatpush1.bf16.msra.mxu0 %v5897_v21  ;;  %835 = vmatpush1.bf16.msra.mxu1 %v5900_v22  ;;  %v5983_v21 = vld [vmem:[#allocation9 + $0x154] ss:$12 sps:$4 sm:$0xff]   ;;  %v5984_v22 = vld [vmem:[#allocation9 + $0x158] ss:$12 sps:$4 sm:$0xff]  }
  0xab   :  { %750 = vmatprep.subr.bf16.mxu0 %v5905_v23  ;;  %836 = vmatprep.subr.bf16.mxu1 %v5908_v24  ;;  %v5981_v23 = vld [vmem:[#allocation9 + $0x150] ss:$12 sps:$4 sm:$0xff]   ;;  %v5985_v24 = vld [vmem:[#allocation9 + $0x98] ss:$12 sps:$4 sm:$0xff]  }
  0xae   :  { %751 = vmatpush1.bf16.msra.mxu0 %v5903_v25  ;;  %837 = vmatpush1.bf16.msra.mxu1 %v5906_v26  ;;  %v5988_v25 = vld [vmem:[#allocation9 + $0x16c] ss:$12 sps:$4 sm:$0xff]   ;;  %v5989_v26 = vld [vmem:[#allocation9 + $0x170] ss:$12 sps:$4 sm:$0xff]  }
  0xaf   :  { %752 = vmatprep.subr.bf16.mxu0 %v5911_v27  ;;  %838 = vmatprep.subr.bf16.mxu1 %v5914_v28  ;;  %v5986_v27 = vld [vmem:[#allocation9 + $0x168] ss:$12 sps:$4 sm:$0xff]   ;;  %v5990_v28 = vld [vmem:[#allocation9 + $0xb0] ss:$12 sps:$4 sm:$0xff]  }
  0xb2   :  { %753 = vmatpush1.bf16.msra.mxu0 %v5909_v29  ;;  %839 = vmatpush1.bf16.msra.mxu1 %v5912_v30  ;;  %v5993_v29 = vld [vmem:[#allocation9 + $0x184] ss:$12 sps:$4 sm:$0xff]   ;;  %v5994_v30 = vld [vmem:[#allocation9 + $0x248] ss:$12 sps:$4 sm:$0xff]  }
  0xb3   :  { %754 = vmatprep.subr.bf16.mxu0 %v5917_v31  ;;  %840 = vmatprep.subr.bf16.mxu1 %v5920_v32  ;;  %v199_v31 = vlaneseq }
  0xb5   :  { %v200_v32 = vshrl.u32 %v199_v31, 7  ;;  %v6020_v31 = vld [vmem:[#allocation9 + $0x200] ss:$12 sps:$4 sm:$0xff]  }
  0xb6   :  { %755 = vmatpush1.bf16.msra.mxu0 %v5915_v33  ;;  %841 = vmatpush1.bf16.msra.mxu1 %v5918_v34  ;;  %v197_v34 = vld [vmem:[#allocation8] sm:$0xf] }
  0xb7   :  { %756 = vmatprep.subr.bf16.mxu0 %v5923_v35  ;;  %842 = vmatprep.subr.bf16.mxu1 %v5926_v36  ;;  %v6859_v33 = vsub.s32 0, %v200_v32  ;;  %v6861_v35 = vsub.s32 2, %v200_v32  ;;  %v6863_v36 = vsub.s32 1, %v200_v32 }
  0xb9   :  { %v210_v39 = vrot.slane %v197_v34, %v6861_v35  ;;  %v206_v40 = vrot.slane %v197_v34, %v6863_v36 }
  0xba   :  { %757 = vmatpush1.bf16.msra.mxu0 %v5921_v37  ;;  %843 = vmatpush1.bf16.msra.mxu1 %v5924_v38  ;;  %v6865_v37 = vsub.s32 3, %v200_v32  ;;  %v202_v38 = vrot.slane %v197_v34, %v6859_v33  ;;  %v6023_v32 = vld [vmem:[#allocation9 + $0x214] ss:$12 sps:$4 sm:$0xff]  }
  0xbb   :  { %1532 = vmatprep.subr.bf16.mxu0 %v5929_v41  ;;  %5570 = vmatprep.subr.bf16.mxu1 %v5954_v42 }
  0xbc   :  { %v214_v41 = vrot.slane %v197_v34, %v6865_v37  ;;  %v6024_v34 = vld [vmem:[#allocation9 + $0x2d8] ss:$12 sps:$4 sm:$0xff]  }
  0xbd   :  { %775 = vmatmul.mubr.bf16.vlgmr.msra.gmra.mrb[0].mxu0 %v6855_v44  ;;  %861 = vmatmul.mubr.bf16.vlgmr.msra.gmra.mrb[0].mxu1 %v6855_v44 }
  0xbe   :  { %1533 = vmatpush1.bf16.msra.mxu0 %v5927_v43  ;;  %5571 = vmatpush3.bf16.msra.mxu1 %v5955_v46 }
  0xbf   :  { %1534 = vmatprep.subr.bf16.mxu0 %v5932_v45  ;;  %5572 = vmatprep.subr.bf16.mxu1 %v5959_v47 }
  0xc2   :  { %1535 = vmatpush1.bf16.msra.mxu0 %v5930_v48  ;;  %5573 = vmatpush3.bf16.msra.mxu1 %v5960_v49 }
  0xc3   :  { %1536 = vmatprep.subr.bf16.mxu0 %v5935_v51  ;;  %5574 = vmatprep.subr.bf16.mxu1 %v5964_v52 }
  0xc6   :  { %1537 = vmatpush1.bf16.msra.mxu0 %v5933_v53  ;;  %5575 = vmatpush3.bf16.msra.mxu1 %v5965_v54 }
  0xc7   :  { %1538 = vmatprep.subr.bf16.mxu0 %v5938_v55  ;;  %5576 = vmatprep.subr.bf16.mxu1 %v5969_v56 }
  0xca   :  { %1539 = vmatpush1.bf16.msra.mxu0 %v5936_v57  ;;  %5577 = vmatpush3.bf16.msra.mxu1 %v5970_v58 }
  0xcb   :  { %1540 = vmatprep.subr.bf16.mxu0 %v5941_v59  ;;  %5578 = vmatprep.subr.bf16.mxu1 %v5974_v60 }
  0xce   :  { %1541 = vmatpush1.bf16.msra.mxu0 %v5939_v61  ;;  %5579 = vmatpush3.bf16.msra.mxu1 %v5975_v62 }
  0xcf   :  { %1542 = vmatprep.subr.bf16.mxu0 %v5944_v63  ;;  %5580 = vmatprep.subr.bf16.mxu1 %v5979_v0 }
  0xd2   :  { %1543 = vmatpush1.bf16.msra.mxu0 %v5942_v1  ;;  %5581 = vmatpush3.bf16.msra.mxu1 %v5980_v2 }
  0xd3   :  { %1544 = vmatprep.subr.bf16.mxu0 %v5947_v3  ;;  %5582 = vmatprep.subr.bf16.mxu1 %v5984_v22  ;;  %v6006_v22 = vld [vmem:[#allocation9 + $0x1c8] ss:$12 sps:$4 sm:$0xff]  }
  0xd6   :  { %1545 = vmatpush1.bf16.msra.mxu0 %v5945_v4  ;;  %5583 = vmatpush3.bf16.msra.mxu1 %v5985_v24  ;;  %v5991_v4 = vld [vmem:[#allocation9 + $0x180] ss:$12 sps:$4 sm:$0xff]   ;;  %v6013_v24 = vld [vmem:[#allocation9 + $0x1e4] ss:$12 sps:$4 sm:$0xff]  }
  0xd7   :  { %1546 = vmatprep.subr.bf16.mxu0 %v5950_v5  ;;  %5584 = vmatprep.subr.bf16.mxu1 %v5989_v26  ;;  %v5995_v5 = vld [vmem:[#allocation9 + $0x188] ss:$12 sps:$4 sm:$0xff]   ;;  %v6011_v26 = vld [vmem:[#allocation9 + $0x1e0] ss:$12 sps:$4 sm:$0xff]  }
  0xda   :  { %1547 = vmatpush1.bf16.msra.mxu0 %v5948_v6  ;;  %5585 = vmatpush3.bf16.msra.mxu1 %v5990_v28  ;;  %v6018_v28 = vld [vmem:[#allocation9 + $0x1fc] ss:$12 sps:$4 sm:$0xff]  }
  0xdb   :  { %1548 = vmatprep.subr.bf16.mxu0 %v5953_v7  ;;  %5592 = vmatprep.subr.bf16.mxu1 %v5994_v30  ;;  %v6016_v30 = vld [vmem:[#allocation9 + $0x1f8] ss:$12 sps:$4 sm:$0xff]  }
  0xde   :  { %1549 = vmatpush1.bf16.msra.mxu0 %v5951_v9 }
  0xdf   :  { %1550 = vmatprep.subr.bf16.mxu0 %v5958_v10 }
  0xe2   :  { %1551 = vmatpush1.bf16.msra.mxu0 %v5956_v11  ;;  %v5998_v11 = vld [vmem:[#allocation9 + $0x19c] ss:$12 sps:$4 sm:$0xff]  }
  0xe3   :  { %1552 = vmatprep.subr.bf16.mxu0 %v5963_v12  ;;  %v5999_v12 = vld [vmem:[#allocation9 + $0x260] ss:$12 sps:$4 sm:$0xff]  }
  0xe6   :  { %1553 = vmatpush1.bf16.msra.mxu0 %v5961_v13  ;;  %v5996_v13 = vld [vmem:[#allocation9 + $0x198] ss:$12 sps:$4 sm:$0xff]  }
  0xe7   :  { %1554 = vmatprep.subr.bf16.mxu0 %v5968_v14  ;;  %v6000_v14 = vld [vmem:[#allocation9 + $0x1a0] ss:$12 sps:$4 sm:$0xff]  }
  0xea   :  { %1555 = vmatpush1.bf16.msra.mxu0 %v5966_v15  ;;  %v6003_v15 = vld [vmem:[#allocation9 + $0x1b4] ss:$12 sps:$4 sm:$0xff]  }
  0xeb   :  { %1556 = vmatprep.subr.bf16.mxu0 %v5973_v17  ;;  %v6004_v17 = vld [vmem:[#allocation9 + $0x278] ss:$12 sps:$4 sm:$0xff]  }
  0xee   :  { %1557 = vmatpush1.bf16.msra.mxu0 %v5971_v18  ;;  %v6001_v18 = vld [vmem:[#allocation9 + $0x1b0] ss:$12 sps:$4 sm:$0xff]  }
  0xef   :  { %1558 = vmatprep.subr.bf16.mxu0 %v5978_v19  ;;  %v6005_v19 = vld [vmem:[#allocation9 + $0x1b8] ss:$12 sps:$4 sm:$0xff]  }
  0xf2   :  { %1559 = vmatpush1.bf16.msra.mxu0 %v5976_v20  ;;  %v6008_v20 = vld [vmem:[#allocation9 + $0x1cc] ss:$12 sps:$4 sm:$0xff]  }
  0xf3   :  { %1560 = vmatprep.subr.bf16.mxu0 %v5983_v21  ;;  %v6009_v21 = vld [vmem:[#allocation9 + $0x290] ss:$12 sps:$4 sm:$0xff]  }
  0xf6   :  { %1561 = vmatpush1.bf16.msra.mxu0 %v5981_v23  ;;  %v6010_v23 = vld [vmem:[#allocation9 + $0x1d0] ss:$12 sps:$4 sm:$0xff]  }
  0xf7   :  { %1562 = vmatprep.subr.bf16.mxu0 %v5988_v25  ;;  %v6014_v25 = vld [vmem:[#allocation9 + $0x2a8] ss:$12 sps:$4 sm:$0xff]  }
  0xfa   :  { %1563 = vmatpush1.bf16.msra.mxu0 %v5986_v27  ;;  %v6015_v27 = vld [vmem:[#allocation9 + $0x1e8] ss:$12 sps:$4 sm:$0xff]  }
  0xfb   :  { %1575 = vmatprep.subr.bf16.mxu0 %v5993_v29  ;;  %v6019_v29 = vld [vmem:[#allocation9 + $0x2c0] ss:$12 sps:$4 sm:$0xff]  }
 0x190   :  { %v776_v42 = vpop.f32.mrb[0].mxu0  ;;  %v862_v43 = vpop.f32.mrb[0].mxu1 }
 0x191   :  { %v5702_v45 = vadd.f32 %v776_v42, %v202_v38  ;;  %v5706_v46 = vadd.f32 %v862_v43, %v210_v39  ;;  %v778_v47 = vpop.f32.mrb[1].mxu0  ;;  %v864_v48 = vpop.f32.mrb[1].mxu1  ;;  %v6026_v42 = vld [vmem:[#allocation9 + $0x228] ss:$12 sps:$4 sm:$0xff]   ;;  %v6030_v43 = vld [vmem:[#allocation9 + $0x230] ss:$12 sps:$4 sm:$0xff]  }
 0x192   :  { %v5703_v49 = vadd.f32 %v778_v47, %v206_v40  ;;  %v5707_v51 = vadd.f32 %v864_v48, %v214_v41  ;;  %v780_v52 = vpop.f32.mrb[2].mxu0  ;;  %v866_v53 = vpop.f32.mrb[2].mxu1  ;;  %v6031_v47 = vld [vmem:[#allocation9 + $0x240] ss:$12 sps:$4 sm:$0xff]   ;;  %v6034_v48 = vld [vmem:[#allocation6 + $0x10] ss:$48 sps:$4 sm:$0xff]  }
 0x193   :  { %v873_v54 = vmax.f32 %v5706_v46, 0.0  ;;  %v5704_v55 = vadd.f32 %v780_v52, %v202_v38  ;;  %v5708_v56 = vadd.f32 %v866_v53, %v210_v39  ;;  %v782_v57 = vpop.f32.mrb[3].mxu0  ;;  %v868_v58 = vpop.f32.mrb[3].mxu1  ;;  %v871_v59 = vmax.f32 %v5702_v45, 0.0  ;;  %v6021_v38 = vld [vmem:[#allocation9 + $0x210] ss:$12 sps:$4 sm:$0xff]  }
 0x194   :  { %v5705_v60 = vadd.f32 %v782_v57, %v206_v40  ;;  %v5709_v61 = vadd.f32 %v868_v58, %v214_v41  ;;  %v872_v62 = vmax.f32 %v5703_v49, 0.0  ;;  %v874_v63 = vmax.f32 %v5707_v51, 0.0  ;;  %v6025_v39 = vld [vmem:[#allocation9 + $0x218] ss:$12 sps:$4 sm:$0xff]   ;;  %v6029_v41 = vld [vmem:[#allocation9 + $0x2f0] ss:$12 sps:$4 sm:$0xff]  }
 0x195   :  { %v875_v0 = vmax.f32 %v5704_v55, 0.0  ;;  %v877_v1 = vmax.f32 %v5708_v56, 0.0  ;;  %v6028_v40 = vld [vmem:[#allocation9 + $0x22c] ss:$12 sps:$4 sm:$0xff]   ;;  %v6033_v45 = vld [vmem:[#allocation9 + $0x244] ss:$12 sps:$4 sm:$0xff]  }
 0x196   :  { %v876_v2 = vmax.f32 %v5705_v60, 0.0  ;;  %v878_v3 = vmax.f32 %v5709_v61, 0.0  ;;  %v6036_v46 = vld [vmem:[#allocation6 + $0x14] ss:$48 sps:$4 sm:$0xff]   ;;  %v6040_v53 = vld [vmem:[#allocation6 + $0x70] ss:$48 sps:$4 sm:$0xff]  }
 0x197   :  { %v885_v6 = vpack.c.bf16 %v875_v0, %v871_v59  ;;  %v6871_v7 = vpack.c.bf16 %v877_v1, %v873_v54  ;;  %v6039_v49 = vld [vmem:[#allocation9 + $0x25c] ss:$12 sps:$4 sm:$0xff]   ;;  %v6037_v52 = vld [vmem:[#allocation9 + $0x258] ss:$12 sps:$4 sm:$0xff]   ;;  %v6045_v54 = vld [vmem:[#allocation9 + $0x274] ss:$12 sps:$4 sm:$0xff]  }
 0x198   :  { %v886_v9 = vpack.c.bf16 %v876_v2, %v872_v62  ;;  %v888_v10 = vpack.c.bf16 %v878_v3, %v874_v63  ;;  %v6042_v51 = vld [vmem:[#allocation6 + $0x74] ss:$48 sps:$4 sm:$0xff]   ;;  %v6043_v56 = vld [vmem:[#allocation9 + $0x270] ss:$12 sps:$4 sm:$0xff]   ;;  %v6046_v57 = vld [vmem:[#allocation6 + $0xd0] ss:$48 sps:$4 sm:$0xff]  }
 0x199   :  { %v6048_v55 = vld [vmem:[#allocation6 + $0xd4] ss:$48 sps:$4 sm:$0xff]   ;;  %v6052_v61 = vld [vmem:[#allocation6 + $0x130] ss:$48 sps:$4 sm:$0xff]   ;;  %v6055_v0 = vld [vmem:[#allocation9 + $0x2a0] ss:$12 sps:$4 sm:$0xff]  }
 0x19a   :  { %1564 = vmatprep.mubr.bf16.mxu0 %v886_v9  ;;  %1650 = vmatprep.mubr.bf16.mxu1 %v886_v9  ;;  %v6051_v58 = vld [vmem:[#allocation9 + $0x28c] ss:$12 sps:$4 sm:$0xff]   ;;  %v6049_v60 = vld [vmem:[#allocation9 + $0x288] ss:$12 sps:$4 sm:$0xff]   ;;  %v6057_v62 = vld [vmem:[#allocation9 + $0x2a4] ss:$12 sps:$4 sm:$0xff]  }
 0x19b   :  { %1565 = vmatmul.mubr.bf16.vlgmr.msra.gmra.mrb[4].mxu0 %v885_v6  ;;  %1651 = vmatmul.mubr.bf16.vlgmr.msra.gmra.mrb[4].mxu1 %v885_v6  ;;  %v6054_v59 = vld [vmem:[#allocation6 + $0x134] ss:$48 sps:$4 sm:$0xff]   ;;  %v6058_v1 = vld [vmem:[#allocation6 + $0x190] ss:$48 sps:$4 sm:$0xff]  }
 0x19c   :  { %1576 = vmatpush1.bf16.msra.mxu0 %v5991_v4  ;;  %5593 = vmatpush3.bf16.msra.mxu1 %v5995_v5  ;;  %v6060_v63 = vld [vmem:[#allocation6 + $0x194] ss:$48 sps:$4 sm:$0xff]   ;;  %v6064_v5 = vld [vmem:[#allocation6 + $0x1f0] ss:$48 sps:$4 sm:$0xff]  }
 0x19d   :  { %1607 = vmatprep.mubr.bf16.mxu0 %v888_v10  ;;  %1691 = vmatprep.mubr.bf16.mxu1 %v888_v10  ;;  %v6063_v2 = vld [vmem:[#allocation9 + $0x2bc] ss:$12 sps:$4 sm:$0xff]   ;;  %v6061_v4 = vld [vmem:[#allocation9 + $0x2b8] ss:$12 sps:$4 sm:$0xff]   ;;  %v6069_v6 = vld [vmem:[#allocation9 + $0x2d4] ss:$12 sps:$4 sm:$0xff]  }
 0x19e   :  { %1577 = vmatprep.subr.bf16.mxu0 %v5998_v11  ;;  %5594 = vmatprep.subr.bf16.mxu1 %v5999_v12  ;;  %v6066_v3 = vld [vmem:[#allocation6 + $0x1f4] ss:$48 sps:$4 sm:$0xff]   ;;  %v6067_v10 = vld [vmem:[#allocation9 + $0x2d0] ss:$12 sps:$4 sm:$0xff]   ;;  %v6070_v11 = vld [vmem:[#allocation6 + $0x250] ss:$48 sps:$4 sm:$0xff]  }
 0x19f   :  { %v6072_v9 = vld [vmem:[#allocation6 + $0x254] ss:$48 sps:$4 sm:$0xff]  }
 0x1a0   :  { %1578 = vmatpush1.bf16.msra.mxu0 %v5996_v13  ;;  %5595 = vmatpush3.bf16.msra.mxu1 %v6000_v14  ;;  %v6075_v12 = vld [vmem:[#allocation9 + $0x2ec] ss:$12 sps:$4 sm:$0xff]   ;;  %v6073_v14 = vld [vmem:[#allocation9 + $0x2e8] ss:$12 sps:$4 sm:$0xff]  }
 0x1a1   :  { %1579 = vmatprep.subr.bf16.mxu0 %v6003_v15  ;;  %5596 = vmatprep.subr.bf16.mxu1 %v6004_v17  ;;  %v6078_v13 = vld [vmem:[#allocation6 + $0x2b4] ss:$48 sps:$4 sm:$0xff]   ;;  %v6076_v15 = vld [vmem:[#allocation6 + $0x2b0] ss:$48 sps:$4 sm:$0xff]  }
 0x1a2   :  { %v6081_v17 = vld [vmem:[#allocation6 + $0x314] ss:$48 sps:$4 sm:$0xff]  }
 0x1a4   :  { %1580 = vmatpush1.bf16.msra.mxu0 %v6001_v18  ;;  %5597 = vmatpush3.bf16.msra.mxu1 %v6005_v19  ;;  %v6084_v18 = vld [vmem:[#allocation6 + $0x1c] ss:$48 sps:$4 sm:$0xff]   ;;  %v6079_v19 = vld [vmem:[#allocation6 + $0x310] ss:$48 sps:$4 sm:$0xff]  }
 0x1a5   :  { %1581 = vmatprep.subr.bf16.mxu0 %v6008_v20  ;;  %5598 = vmatprep.subr.bf16.mxu1 %v6009_v21  ;;  %v6082_v20 = vld [vmem:[#allocation6 + $0x18] ss:$48 sps:$4 sm:$0xff]   ;;  %v6087_v21 = vld [vmem:[#allocation6 + $0x374] ss:$48 sps:$4 sm:$0xff]  }
 0x1a8   :  { %1582 = vmatpush1.bf16.msra.mxu0 %v6006_v22  ;;  %5599 = vmatpush3.bf16.msra.mxu1 %v6010_v23  ;;  %v6090_v22 = vld [vmem:[#allocation6 + $0x7c] ss:$48 sps:$4 sm:$0xff]   ;;  %v6085_v23 = vld [vmem:[#allocation6 + $0x370] ss:$48 sps:$4 sm:$0xff]  }
 0x1a9   :  { %1583 = vmatprep.subr.bf16.mxu0 %v6013_v24  ;;  %5600 = vmatprep.subr.bf16.mxu1 %v6014_v25  ;;  %v6088_v24 = vld [vmem:[#allocation6 + $0x78] ss:$48 sps:$4 sm:$0xff]   ;;  %v6093_v25 = vld [vmem:[#allocation6 + $0x3d4] ss:$48 sps:$4 sm:$0xff]  }
 0x1ac   :  { %1584 = vmatpush1.bf16.msra.mxu0 %v6011_v26  ;;  %5601 = vmatpush3.bf16.msra.mxu1 %v6015_v27  ;;  %v6096_v26 = vld [vmem:[#allocation6 + $0xdc] ss:$48 sps:$4 sm:$0xff]   ;;  %v6091_v27 = vld [vmem:[#allocation6 + $0x3d0] ss:$48 sps:$4 sm:$0xff]  }
 0x1ad   :  { %1585 = vmatprep.subr.bf16.mxu0 %v6018_v28  ;;  %5602 = vmatprep.subr.bf16.mxu1 %v6019_v29  ;;  %v6094_v28 = vld [vmem:[#allocation6 + $0xd8] ss:$48 sps:$4 sm:$0xff]   ;;  %v6099_v29 = vld [vmem:[#allocation6 + $0x434] ss:$48 sps:$4 sm:$0xff]  }
 0x1b0   :  { %1586 = vmatpush1.bf16.msra.mxu0 %v6016_v30  ;;  %5603 = vmatpush3.bf16.msra.mxu1 %v6020_v31  ;;  %v6102_v30 = vld [vmem:[#allocation6 + $0x13c] ss:$48 sps:$4 sm:$0xff]   ;;  %v6100_v31 = vld [vmem:[#allocation6 + $0x138] ss:$48 sps:$4 sm:$0xff]  }
 0x1b1   :  { %1587 = vmatprep.subr.bf16.mxu0 %v6023_v32  ;;  %5604 = vmatprep.subr.bf16.mxu1 %v6024_v34  ;;  %v6105_v32 = vld [vmem:[#allocation6 + $0x494] ss:$48 sps:$4 sm:$0xff]   ;;  %v6108_v34 = vld [vmem:[#allocation6 + $0x19c] ss:$48 sps:$4 sm:$0xff]  }
 0x1b4   :  { %1588 = vmatpush1.bf16.msra.mxu0 %v6021_v38  ;;  %5605 = vmatpush3.bf16.msra.mxu1 %v6025_v39  ;;  %v6103_v38 = vld [vmem:[#allocation6 + $0x490] ss:$48 sps:$4 sm:$0xff]   ;;  %v6106_v39 = vld [vmem:[#allocation6 + $0x198] ss:$48 sps:$4 sm:$0xff]  }
 0x1b5   :  { %1589 = vmatprep.subr.bf16.mxu0 %v6028_v40  ;;  %5606 = vmatprep.subr.bf16.mxu1 %v6029_v41  ;;  %v6111_v40 = vld [vmem:[#allocation6 + $0x4f4] ss:$48 sps:$4 sm:$0xff]   ;;  %v6114_v41 = vld [vmem:[#allocation6 + $0x1fc] ss:$48 sps:$4 sm:$0xff]  }
 0x1b8   :  { %1590 = vmatpush1.bf16.msra.mxu0 %v6026_v42  ;;  %5607 = vmatpush3.bf16.msra.mxu1 %v6030_v43  ;;  %v6109_v42 = vld [vmem:[#allocation6 + $0x4f0] ss:$48 sps:$4 sm:$0xff]   ;;  %v6112_v43 = vld [vmem:[#allocation6 + $0x1f8] ss:$48 sps:$4 sm:$0xff]  }
 0x1b9   :  { %1591 = vmatprep.subr.bf16.mxu0 %v6033_v45  ;;  %2312 = vmatprep.subr.bf16.mxu1 %v6036_v46  ;;  %v6117_v45 = vld [vmem:[#allocation6 + $0x554] ss:$48 sps:$4 sm:$0xff]   ;;  %v6120_v46 = vld [vmem:[#allocation6 + $0x25c] ss:$48 sps:$4 sm:$0xff]  }
 0x1bb   :  { %1692 = vmatmul.mubr.bf16.vlgmr.msra.gmra.mrb[8].mxu1 %v6871_v7 }
 0x1bc   :  { %1592 = vmatpush1.bf16.msra.mxu0 %v6031_v47  ;;  %2313 = vmatpush1.bf16.msra.mxu1 %v6034_v48  ;;  %v6115_v47 = vld [vmem:[#allocation6 + $0x550] ss:$48 sps:$4 sm:$0xff]   ;;  %v6118_v48 = vld [vmem:[#allocation6 + $0x258] ss:$48 sps:$4 sm:$0xff]  }
 0x1bd   :  { %1593 = vmatprep.subr.bf16.mxu0 %v6039_v49  ;;  %2314 = vmatprep.subr.bf16.mxu1 %v6042_v51  ;;  %v6123_v49 = vld [vmem:[#allocation6 + $0x5b4] ss:$48 sps:$4 sm:$0xff]   ;;  %v6126_v51 = vld [vmem:[#allocation6 + $0x2bc] ss:$48 sps:$4 sm:$0xff]  }
 0x1be   :  { %2344 = vmatprep.mubr.bf16.mxu1 %v6845_v50 }
 0x1c0   :  { %1594 = vmatpush1.bf16.msra.mxu0 %v6037_v52  ;;  %2315 = vmatpush1.bf16.msra.mxu1 %v6040_v53  ;;  %v6121_v52 = vld [vmem:[#allocation6 + $0x5b0] ss:$48 sps:$4 sm:$0xff]   ;;  %v6124_v53 = vld [vmem:[#allocation6 + $0x2b8] ss:$48 sps:$4 sm:$0xff]  }
 0x1c1   :  { %1595 = vmatprep.subr.bf16.mxu0 %v6045_v54  ;;  %2316 = vmatprep.subr.bf16.mxu1 %v6048_v55  ;;  %v6129_v54 = vld [vmem:[#allocation6 + $0x614] ss:$48 sps:$4 sm:$0xff]   ;;  %v6132_v55 = vld [vmem:[#allocation6 + $0x31c] ss:$48 sps:$4 sm:$0xff]  }
 0x1c4   :  { %1596 = vmatpush1.bf16.msra.mxu0 %v6043_v56  ;;  %2317 = vmatpush1.bf16.msra.mxu1 %v6046_v57  ;;  %v6127_v56 = vld [vmem:[#allocation6 + $0x610] ss:$48 sps:$4 sm:$0xff]   ;;  %v6130_v57 = vld [vmem:[#allocation6 + $0x318] ss:$48 sps:$4 sm:$0xff]  }
 0x1c5   :  { %1597 = vmatprep.subr.bf16.mxu0 %v6051_v58  ;;  %2318 = vmatprep.subr.bf16.mxu1 %v6054_v59  ;;  %v6135_v58 = vld [vmem:[#allocation6 + $0x674] ss:$48 sps:$4 sm:$0xff]   ;;  %v6138_v59 = vld [vmem:[#allocation6 + $0x37c] ss:$48 sps:$4 sm:$0xff]  }
 0x1c8   :  { %1598 = vmatpush1.bf16.msra.mxu0 %v6049_v60  ;;  %2319 = vmatpush1.bf16.msra.mxu1 %v6052_v61  ;;  %v6133_v60 = vld [vmem:[#allocation6 + $0x670] ss:$48 sps:$4 sm:$0xff]   ;;  %v6136_v61 = vld [vmem:[#allocation6 + $0x378] ss:$48 sps:$4 sm:$0xff]  }
 0x1c9   :  { %1599 = vmatprep.subr.bf16.mxu0 %v6057_v62  ;;  %2320 = vmatprep.subr.bf16.mxu1 %v6060_v63  ;;  %v6141_v62 = vld [vmem:[#allocation6 + $0x6d4] ss:$48 sps:$4 sm:$0xff]   ;;  %v6144_v63 = vld [vmem:[#allocation6 + $0x3dc] ss:$48 sps:$4 sm:$0xff]  }
 0x1cc   :  { %1600 = vmatpush1.bf16.msra.mxu0 %v6055_v0  ;;  %2321 = vmatpush1.bf16.msra.mxu1 %v6058_v1  ;;  %v6139_v0 = vld [vmem:[#allocation6 + $0x6d0] ss:$48 sps:$4 sm:$0xff]   ;;  %v6142_v1 = vld [vmem:[#allocation6 + $0x3d8] ss:$48 sps:$4 sm:$0xff]  }
 0x1cd   :  { %1601 = vmatprep.subr.bf16.mxu0 %v6063_v2  ;;  %2322 = vmatprep.subr.bf16.mxu1 %v6066_v3  ;;  %v6147_v2 = vld [vmem:[#allocation6 + $0x734] ss:$48 sps:$4 sm:$0xff]   ;;  %v6150_v3 = vld [vmem:[#allocation6 + $0x43c] ss:$48 sps:$4 sm:$0xff]  }
 0x1d0   :  { %1602 = vmatpush1.bf16.msra.mxu0 %v6061_v4  ;;  %2323 = vmatpush1.bf16.msra.mxu1 %v6064_v5  ;;  %v6145_v4 = vld [vmem:[#allocation6 + $0x730] ss:$48 sps:$4 sm:$0xff]   ;;  %v6148_v5 = vld [vmem:[#allocation6 + $0x438] ss:$48 sps:$4 sm:$0xff]  }
 0x1d1   :  { %1603 = vmatprep.subr.bf16.mxu0 %v6069_v6  ;;  %2324 = vmatprep.subr.bf16.mxu1 %v6072_v9  ;;  %v6153_v6 = vld [vmem:[#allocation6 + $0x794] ss:$48 sps:$4 sm:$0xff]   ;;  %v6156_v9 = vld [vmem:[#allocation6 + $0x49c] ss:$48 sps:$4 sm:$0xff]  }
 0x1d4   :  { %1604 = vmatpush1.bf16.msra.mxu0 %v6067_v10  ;;  %2325 = vmatpush1.bf16.msra.mxu1 %v6070_v11  ;;  %v6151_v10 = vld [vmem:[#allocation6 + $0x790] ss:$48 sps:$4 sm:$0xff]   ;;  %v6154_v11 = vld [vmem:[#allocation6 + $0x498] ss:$48 sps:$4 sm:$0xff]  }
 0x1d5   :  { %1605 = vmatprep.subr.bf16.mxu0 %v6075_v12  ;;  %2326 = vmatprep.subr.bf16.mxu1 %v6078_v13  ;;  %v6159_v12 = vld [vmem:[#allocation6 + $0x7f4] ss:$48 sps:$4 sm:$0xff]   ;;  %v6162_v13 = vld [vmem:[#allocation6 + $0x4fc] ss:$48 sps:$4 sm:$0xff]  }
 0x1d8   :  { %1606 = vmatpush1.bf16.msra.mxu0 %v6073_v14  ;;  %2327 = vmatpush1.bf16.msra.mxu1 %v6076_v15  ;;  %v6157_v14 = vld [vmem:[#allocation6 + $0x7f0] ss:$48 sps:$4 sm:$0xff]   ;;  %v6160_v15 = vld [vmem:[#allocation6 + $0x4f8] ss:$48 sps:$4 sm:$0xff]  }
 0x1d9   :  { %2328 = vmatprep.subr.bf16.mxu1 %v6081_v17  ;;  %2398 = vmatprep.subr.bf16.mxu0 %v6084_v18  ;;  %v6165_v17 = vld [vmem:[#allocation6 + $0x854] ss:$48 sps:$4 sm:$0xff]   ;;  %v6168_v18 = vld [vmem:[#allocation6 + $0x55c] ss:$48 sps:$4 sm:$0xff]  }
 0x1db   :  { %1608 = vmatmul.mubr.bf16.vlgmr.msra.gmra.mrb[4].mxu0 %v6871_v7  ;;  %v6097_v7 = vld [vmem:[#allocation6 + $0x430] ss:$48 sps:$4 sm:$0xff]  }
 0x1dc   :  { %2329 = vmatpush1.bf16.msra.mxu1 %v6079_v19  ;;  %2399 = vmatpush1.bf16.msra.mxu0 %v6082_v20  ;;  %v6163_v19 = vld [vmem:[#allocation6 + $0x850] ss:$48 sps:$4 sm:$0xff]   ;;  %v6166_v20 = vld [vmem:[#allocation6 + $0x558] ss:$48 sps:$4 sm:$0xff]  }
 0x1dd   :  { %2330 = vmatprep.subr.bf16.mxu1 %v6087_v21  ;;  %2400 = vmatprep.subr.bf16.mxu0 %v6090_v22  ;;  %v6171_v21 = vld [vmem:[#allocation6 + $0x8b4] ss:$48 sps:$4 sm:$0xff]   ;;  %v6174_v22 = vld [vmem:[#allocation6 + $0x5bc] ss:$48 sps:$4 sm:$0xff]  }
 0x1de   :  { %2430 = vmatprep.mubr.bf16.mxu0 %v6845_v50 }
 0x1e0   :  { %2331 = vmatpush1.bf16.msra.mxu1 %v6085_v23  ;;  %2401 = vmatpush1.bf16.msra.mxu0 %v6088_v24  ;;  %v6169_v23 = vld [vmem:[#allocation6 + $0x8b0] ss:$48 sps:$4 sm:$0xff]   ;;  %v6172_v24 = vld [vmem:[#allocation6 + $0x5b8] ss:$48 sps:$4 sm:$0xff]  }
 0x1e1   :  { %2332 = vmatprep.subr.bf16.mxu1 %v6093_v25  ;;  %2402 = vmatprep.subr.bf16.mxu0 %v6096_v26  ;;  %v6177_v25 = vld [vmem:[#allocation6 + $0x61c] ss:$48 sps:$4 sm:$0xff]   ;;  %v6175_v26 = vld [vmem:[#allocation6 + $0x618] ss:$48 sps:$4 sm:$0xff]  }
 0x1e4   :  { %2333 = vmatpush1.bf16.msra.mxu1 %v6091_v27  ;;  %2403 = vmatpush1.bf16.msra.mxu0 %v6094_v28  ;;  %v6180_v27 = vld [vmem:[#allocation6 + $0x67c] ss:$48 sps:$4 sm:$0xff]   ;;  %v6226_v28 = vld [vmem:[#allocation9 + $0x3c8] ss:$12 sps:$4 sm:$0xff]  }
 0x1e5   :  { %2334 = vmatprep.subr.bf16.mxu1 %v6099_v29  ;;  %2404 = vmatprep.subr.bf16.mxu0 %v6102_v30  ;;  %v6227_v29 = vld [vmem:[#allocation9 + $0x308] ss:$12 sps:$4 sm:$0xff]   ;;  %v6231_v30 = vld [vmem:[#allocation9 + $0x3e0] ss:$12 sps:$4 sm:$0xff]  }
 0x1e8   :  { %2335 = vmatpush1.bf16.msra.mxu1 %v6097_v7  ;;  %2405 = vmatpush1.bf16.msra.mxu0 %v6100_v31  ;;  %v6178_v7 = vld [vmem:[#allocation6 + $0x678] ss:$48 sps:$4 sm:$0xff]   ;;  %v6183_v31 = vld [vmem:[#allocation6 + $0x6dc] ss:$48 sps:$4 sm:$0xff]  }
 0x1e9   :  { %2336 = vmatprep.subr.bf16.mxu1 %v6105_v32  ;;  %2406 = vmatprep.subr.bf16.mxu0 %v6108_v34  ;;  %v6232_v32 = vld [vmem:[#allocation9 + $0x320] ss:$12 sps:$4 sm:$0xff]   ;;  %v6236_v34 = vld [vmem:[#allocation9 + $0x3f8] ss:$12 sps:$4 sm:$0xff]  }
 0x1ec   :  { %2337 = vmatpush1.bf16.msra.mxu1 %v6103_v38  ;;  %2407 = vmatpush1.bf16.msra.mxu0 %v6106_v39  ;;  %v6181_v38 = vld [vmem:[#allocation6 + $0x6d8] ss:$48 sps:$4 sm:$0xff]   ;;  %v6186_v39 = vld [vmem:[#allocation6 + $0x73c] ss:$48 sps:$4 sm:$0xff]  }
 0x1ed   :  { %2338 = vmatprep.subr.bf16.mxu1 %v6111_v40  ;;  %2408 = vmatprep.subr.bf16.mxu0 %v6114_v41  ;;  %v6237_v40 = vld [vmem:[#allocation9 + $0x338] ss:$12 sps:$4 sm:$0xff]   ;;  %v6241_v41 = vld [vmem:[#allocation9 + $0x410] ss:$12 sps:$4 sm:$0xff]  }
 0x1f0   :  { %2339 = vmatpush1.bf16.msra.mxu1 %v6109_v42  ;;  %2409 = vmatpush1.bf16.msra.mxu0 %v6112_v43  ;;  %v6184_v42 = vld [vmem:[#allocation6 + $0x738] ss:$48 sps:$4 sm:$0xff]   ;;  %v6189_v43 = vld [vmem:[#allocation6 + $0x79c] ss:$48 sps:$4 sm:$0xff]  }
 0x1f1   :  { %2340 = vmatprep.subr.bf16.mxu1 %v6117_v45  ;;  %2410 = vmatprep.subr.bf16.mxu0 %v6120_v46  ;;  %v6242_v45 = vld [vmem:[#allocation9 + $0x350] ss:$12 sps:$4 sm:$0xff]   ;;  %v6246_v46 = vld [vmem:[#allocation9 + $0x428] ss:$12 sps:$4 sm:$0xff]  }
 0x1f4   :  { %2341 = vmatpush1.bf16.msra.mxu1 %v6115_v47  ;;  %2411 = vmatpush1.bf16.msra.mxu0 %v6118_v48  ;;  %v6187_v47 = vld [vmem:[#allocation6 + $0x798] ss:$48 sps:$4 sm:$0xff]   ;;  %v6192_v48 = vld [vmem:[#allocation6 + $0x7fc] ss:$48 sps:$4 sm:$0xff]  }
 0x1f5   :  { %2342 = vmatprep.subr.bf16.mxu1 %v6123_v49  ;;  %2412 = vmatprep.subr.bf16.mxu0 %v6126_v51  ;;  %v6247_v49 = vld [vmem:[#allocation9 + $0x368] ss:$12 sps:$4 sm:$0xff]   ;;  %v6251_v51 = vld [vmem:[#allocation9 + $0x440] ss:$12 sps:$4 sm:$0xff]  }
 0x1f8   :  { %2343 = vmatpush1.bf16.msra.mxu1 %v6121_v52  ;;  %2413 = vmatpush1.bf16.msra.mxu0 %v6124_v53  ;;  %v6190_v52 = vld [vmem:[#allocation6 + $0x7f8] ss:$48 sps:$4 sm:$0xff]   ;;  %v6195_v53 = vld [vmem:[#allocation6 + $0x85c] ss:$48 sps:$4 sm:$0xff]  }
 0x1f9   :  { %2355 = vmatprep.subr.bf16.mxu1 %v6129_v54  ;;  %2414 = vmatprep.subr.bf16.mxu0 %v6132_v55  ;;  %v6252_v54 = vld [vmem:[#allocation9 + $0x380] ss:$12 sps:$4 sm:$0xff]  }
 0x1fa   :  { %v6193_v55 = vld [vmem:[#allocation6 + $0x858] ss:$48 sps:$4 sm:$0xff]  }
 0x1fb   :  { %2345 = vmatmul.mubr.bf16.vlgmr.msra.gmra.mrb[12].mxu1 %v6849_v8 }
 0x1fc   :  { %2356 = vmatpush1.bf16.msra.mxu1 %v6127_v56  ;;  %2415 = vmatpush1.bf16.msra.mxu0 %v6130_v57  ;;  %v6198_v56 = vld [vmem:[#allocation6 + $0x8bc] ss:$48 sps:$4 sm:$0xff]   ;;  %v6196_v57 = vld [vmem:[#allocation6 + $0x8b8] ss:$48 sps:$4 sm:$0xff]  }
 0x1fd   :  { %2357 = vmatprep.subr.bf16.mxu1 %v6135_v58  ;;  %2416 = vmatprep.subr.bf16.mxu0 %v6138_v59  ;;  %v6201_v58 = vld [vmem:[#allocation9 + $0x304] ss:$12 sps:$4 sm:$0xff]   ;;  %v6199_v59 = vld [vmem:[#allocation9 + $0x300] ss:$12 sps:$4 sm:$0xff]  }
 0x1fe   :  { %2387 = vmatprep.mubr.bf16.mxu1 %v6750_v16 }
 0x200   :  { %2358 = vmatpush1.bf16.msra.mxu1 %v6133_v60  ;;  %2417 = vmatpush1.bf16.msra.mxu0 %v6136_v61  ;;  %v6204_v60 = vld [vmem:[#allocation9 + $0x31c] ss:$12 sps:$4 sm:$0xff]   ;;  %v6202_v61 = vld [vmem:[#allocation9 + $0x318] ss:$12 sps:$4 sm:$0xff]  }
 0x201   :  { %2359 = vmatprep.subr.bf16.mxu1 %v6141_v62  ;;  %2418 = vmatprep.subr.bf16.mxu0 %v6144_v63  ;;  %v6207_v62 = vld [vmem:[#allocation9 + $0x334] ss:$12 sps:$4 sm:$0xff]   ;;  %v6205_v63 = vld [vmem:[#allocation9 + $0x330] ss:$12 sps:$4 sm:$0xff]  }
 0x204   :  { %2360 = vmatpush1.bf16.msra.mxu1 %v6139_v0  ;;  %2419 = vmatpush1.bf16.msra.mxu0 %v6142_v1  ;;  %v6210_v0 = vld [vmem:[#allocation9 + $0x34c] ss:$12 sps:$4 sm:$0xff]   ;;  %v6208_v1 = vld [vmem:[#allocation9 + $0x348] ss:$12 sps:$4 sm:$0xff]  }
 0x205   :  { %2361 = vmatprep.subr.bf16.mxu1 %v6147_v2  ;;  %2420 = vmatprep.subr.bf16.mxu0 %v6150_v3  ;;  %v6213_v2 = vld [vmem:[#allocation9 + $0x364] ss:$12 sps:$4 sm:$0xff]   ;;  %v6211_v3 = vld [vmem:[#allocation9 + $0x360] ss:$12 sps:$4 sm:$0xff]  }
 0x208   :  { %2362 = vmatpush1.bf16.msra.mxu1 %v6145_v4  ;;  %2421 = vmatpush1.bf16.msra.mxu0 %v6148_v5  ;;  %v6216_v4 = vld [vmem:[#allocation9 + $0x37c] ss:$12 sps:$4 sm:$0xff]   ;;  %v6214_v5 = vld [vmem:[#allocation9 + $0x378] ss:$12 sps:$4 sm:$0xff]  }
 0x209   :  { %2363 = vmatprep.subr.bf16.mxu1 %v6153_v6  ;;  %2422 = vmatprep.subr.bf16.mxu0 %v6156_v9  ;;  %v6219_v6 = vld [vmem:[#allocation9 + $0x394] ss:$12 sps:$4 sm:$0xff]   ;;  %v6217_v9 = vld [vmem:[#allocation9 + $0x390] ss:$12 sps:$4 sm:$0xff]  }
 0x20c   :  { %2364 = vmatpush1.bf16.msra.mxu1 %v6151_v10  ;;  %2423 = vmatpush1.bf16.msra.mxu0 %v6154_v11  ;;  %v6222_v10 = vld [vmem:[#allocation9 + $0x3ac] ss:$12 sps:$4 sm:$0xff]   ;;  %v6220_v11 = vld [vmem:[#allocation9 + $0x3a8] ss:$12 sps:$4 sm:$0xff]  }
 0x20d   :  { %2365 = vmatprep.subr.bf16.mxu1 %v6159_v12  ;;  %2424 = vmatprep.subr.bf16.mxu0 %v6162_v13  ;;  %v6225_v12 = vld [vmem:[#allocation9 + $0x3c4] ss:$12 sps:$4 sm:$0xff]   ;;  %v6223_v13 = vld [vmem:[#allocation9 + $0x3c0] ss:$12 sps:$4 sm:$0xff]  }
 0x210   :  { %2366 = vmatpush1.bf16.msra.mxu1 %v6157_v14  ;;  %2425 = vmatpush1.bf16.msra.mxu0 %v6160_v15  ;;  %v6230_v14 = vld [vmem:[#allocation9 + $0x3dc] ss:$12 sps:$4 sm:$0xff]   ;;  %v6228_v15 = vld [vmem:[#allocation9 + $0x3d8] ss:$12 sps:$4 sm:$0xff]  }
 0x211   :  { %2367 = vmatprep.subr.bf16.mxu1 %v6165_v17  ;;  %2426 = vmatprep.subr.bf16.mxu0 %v6168_v18  ;;  %v6235_v17 = vld [vmem:[#allocation9 + $0x3f4] ss:$12 sps:$4 sm:$0xff]   ;;  %v6233_v18 = vld [vmem:[#allocation9 + $0x3f0] ss:$12 sps:$4 sm:$0xff]  }
 0x214   :  { %2368 = vmatpush1.bf16.msra.mxu1 %v6163_v19  ;;  %2427 = vmatpush1.bf16.msra.mxu0 %v6166_v20  ;;  %v6240_v19 = vld [vmem:[#allocation9 + $0x40c] ss:$12 sps:$4 sm:$0xff]   ;;  %v6238_v20 = vld [vmem:[#allocation9 + $0x408] ss:$12 sps:$4 sm:$0xff]  }
 0x215   :  { %2369 = vmatprep.subr.bf16.mxu1 %v6171_v21  ;;  %2428 = vmatprep.subr.bf16.mxu0 %v6174_v22  ;;  %v6245_v21 = vld [vmem:[#allocation9 + $0x424] ss:$12 sps:$4 sm:$0xff]   ;;  %v6243_v22 = vld [vmem:[#allocation9 + $0x420] ss:$12 sps:$4 sm:$0xff]  }
 0x218   :  { %2370 = vmatpush1.bf16.msra.mxu1 %v6169_v23  ;;  %2429 = vmatpush1.bf16.msra.mxu0 %v6172_v24  ;;  %v6250_v23 = vld [vmem:[#allocation9 + $0x43c] ss:$12 sps:$4 sm:$0xff]   ;;  %v6248_v24 = vld [vmem:[#allocation9 + $0x438] ss:$12 sps:$4 sm:$0xff]  }
 0x219   :  { %2441 = vmatprep.subr.bf16.mxu0 %v6177_v25  ;;  %5614 = vmatprep.subr.bf16.mxu1 %v6226_v28 }
 0x21b   :  { %2388 = vmatmul.mubr.bf16.vlgmr.msra.gmra.mrb[12].mxu1 %v6855_v44  ;;  %2431 = vmatmul.mubr.bf16.vlgmr.msra.gmra.mrb[8].mxu0 %v6849_v8 }
 0x21c   :  { %2442 = vmatpush1.bf16.msra.mxu0 %v6175_v26  ;;  %2473 = vmatprep.mubr.bf16.mxu0 %v6750_v16  ;;  %v6255_v26 = vld [vmem:[#allocation9 + $0x454] ss:$12 sps:$4 sm:$0xff]  }
 0x21d   :  { %2443 = vmatprep.subr.bf16.mxu0 %v6180_v27  ;;  %5615 = vmatpush3.bf16.msra.mxu1 %v6227_v29  ;;  %v6256_v27 = vld [vmem:[#allocation9 + $0x458] ss:$12 sps:$4 sm:$0xff]  }
 0x21e   :  { %5616 = vmatprep.subr.bf16.mxu1 %v6231_v30  ;;  %v6257_v29 = vld [vmem:[#allocation9 + $0x398] ss:$12 sps:$4 sm:$0xff]  }
 0x220   :  { %2444 = vmatpush1.bf16.msra.mxu0 %v6178_v7 }
 0x221   :  { %2445 = vmatprep.subr.bf16.mxu0 %v6183_v31  ;;  %5617 = vmatpush3.bf16.msra.mxu1 %v6232_v32  ;;  %v6253_v31 = vld [vmem:[#allocation9 + $0x450] ss:$12 sps:$4 sm:$0xff]  }
 0x222   :  { %5618 = vmatprep.subr.bf16.mxu1 %v6236_v34 }
 0x224   :  { %2446 = vmatpush1.bf16.msra.mxu0 %v6181_v38  ;;  %v6260_v38 = vld [vmem:[#allocation9 + $0x46c] ss:$12 sps:$4 sm:$0xff]  }
 0x225   :  { %2447 = vmatprep.subr.bf16.mxu0 %v6186_v39  ;;  %5619 = vmatpush3.bf16.msra.mxu1 %v6237_v40  ;;  %v6261_v39 = vld [vmem:[#allocation9 + $0x470] ss:$12 sps:$4 sm:$0xff]  }
 0x226   :  { %5620 = vmatprep.subr.bf16.mxu1 %v6241_v41  ;;  %v6262_v40 = vld [vmem:[#allocation9 + $0x3b0] ss:$12 sps:$4 sm:$0xff]   ;;  %v6258_v41 = vld [vmem:[#allocation9 + $0x468] ss:$12 sps:$4 sm:$0xff]  }
 0x228   :  { %2448 = vmatpush1.bf16.msra.mxu0 %v6184_v42  ;;  %v6265_v42 = vld [vmem:[#allocation9 + $0x484] ss:$12 sps:$4 sm:$0xff]  }
 0x229   :  { %2449 = vmatprep.subr.bf16.mxu0 %v6189_v43  ;;  %5621 = vmatpush3.bf16.msra.mxu1 %v6242_v45  ;;  %v6266_v43 = vld [vmem:[#allocation9 + $0x548] ss:$12 sps:$4 sm:$0xff]  }
 0x22a   :  { %5622 = vmatprep.subr.bf16.mxu1 %v6246_v46 }
 0x22c   :  { %2450 = vmatpush1.bf16.msra.mxu0 %v6187_v47 }
 0x22d   :  { %2451 = vmatprep.subr.bf16.mxu0 %v6192_v48  ;;  %5623 = vmatpush3.bf16.msra.mxu1 %v6247_v49 }
 0x22e   :  { %5624 = vmatprep.subr.bf16.mxu1 %v6251_v51 }
 0x230   :  { %2452 = vmatpush1.bf16.msra.mxu0 %v6190_v52 }
 0x231   :  { %2453 = vmatprep.subr.bf16.mxu0 %v6195_v53  ;;  %5625 = vmatpush3.bf16.msra.mxu1 %v6252_v54  ;;  %v6887_v54 = vld [vmem:[#allocation8 + $0x4] sm:$0xf] }
 0x232   :  { %5626 = vmatprep.subr.bf16.mxu1 %v6256_v27  ;;  %v6287_v27 = vld [vmem:[#allocation9 + $0x4e8] ss:$12 sps:$4 sm:$0xff]  }
 0x234   :  { %2454 = vmatpush1.bf16.msra.mxu0 %v6193_v55  ;;  %v1815_v55 = vrot.slane %v6887_v54, %v6859_v33 }
 0x235   :  { %2455 = vmatprep.subr.bf16.mxu0 %v6198_v56  ;;  %5627 = vmatpush3.bf16.msra.mxu1 %v6257_v29  ;;  %v1819_v56 = vrot.slane %v6887_v54, %v6863_v36  ;;  %v6291_v29 = vld [vmem:[#allocation9 + $0x5c0] ss:$12 sps:$4 sm:$0xff]  }
 0x236   :  { %5628 = vmatprep.subr.bf16.mxu1 %v6261_v39 }
 0x238   :  { %2456 = vmatpush1.bf16.msra.mxu0 %v6196_v57 }
 0x239   :  { %3145 = vmatprep.subr.bf16.mxu0 %v6201_v58  ;;  %5629 = vmatpush3.bf16.msra.mxu1 %v6262_v40  ;;  %v6293_v40 = vld [vmem:[#allocation9 + $0x510] ss:$12 sps:$4 sm:$0xff]  }
 0x23a   :  { %5636 = vmatprep.subr.bf16.mxu1 %v6266_v43 }
 0x23b   :  { %2474 = vmatmul.mubr.bf16.vlgmr.msra.gmra.mrb[8].mxu0 %v6855_v44 }
 0x23c   :  { %3146 = vmatpush1.bf16.msra.mxu0 %v6199_v59 }
 0x23d   :  { %3147 = vmatprep.subr.bf16.mxu0 %v6204_v60 }
 0x240   :  { %3148 = vmatpush1.bf16.msra.mxu0 %v6202_v61 }
 0x241   :  { %3149 = vmatprep.subr.bf16.mxu0 %v6207_v62 }
 0x244   :  { %3150 = vmatpush1.bf16.msra.mxu0 %v6205_v63 }
 0x245   :  { %3151 = vmatprep.subr.bf16.mxu0 %v6210_v0 }
 0x248   :  { %3152 = vmatpush1.bf16.msra.mxu0 %v6208_v1 }
 0x249   :  { %3153 = vmatprep.subr.bf16.mxu0 %v6213_v2 }
 0x24c   :  { %3154 = vmatpush1.bf16.msra.mxu0 %v6211_v3 }
 0x24d   :  { %3155 = vmatprep.subr.bf16.mxu0 %v6216_v4 }
 0x250   :  { %3156 = vmatpush1.bf16.msra.mxu0 %v6214_v5 }
 0x251   :  { %3157 = vmatprep.subr.bf16.mxu0 %v6219_v6 }
 0x254   :  { %3158 = vmatpush1.bf16.msra.mxu0 %v6217_v9  ;;  %v6263_v9 = vld [vmem:[#allocation9 + $0x480] ss:$12 sps:$4 sm:$0xff]  }
 0x255   :  { %3159 = vmatprep.subr.bf16.mxu0 %v6222_v10  ;;  %v6267_v10 = vld [vmem:[#allocation9 + $0x488] ss:$12 sps:$4 sm:$0xff]  }
 0x258   :  { %3160 = vmatpush1.bf16.msra.mxu0 %v6220_v11  ;;  %v6270_v11 = vld [vmem:[#allocation9 + $0x49c] ss:$12 sps:$4 sm:$0xff]  }
 0x259   :  { %3161 = vmatprep.subr.bf16.mxu0 %v6225_v12  ;;  %v6271_v12 = vld [vmem:[#allocation9 + $0x560] ss:$12 sps:$4 sm:$0xff]  }
 0x25c   :  { %3162 = vmatpush1.bf16.msra.mxu0 %v6223_v13  ;;  %v6268_v13 = vld [vmem:[#allocation9 + $0x498] ss:$12 sps:$4 sm:$0xff]  }
 0x25d   :  { %3163 = vmatprep.subr.bf16.mxu0 %v6230_v14  ;;  %v6272_v14 = vld [vmem:[#allocation9 + $0x4a0] ss:$12 sps:$4 sm:$0xff]  }
 0x260   :  { %3164 = vmatpush1.bf16.msra.mxu0 %v6228_v15  ;;  %v6275_v15 = vld [vmem:[#allocation9 + $0x4b4] ss:$12 sps:$4 sm:$0xff]  }
 0x261   :  { %3165 = vmatprep.subr.bf16.mxu0 %v6235_v17  ;;  %v6276_v17 = vld [vmem:[#allocation9 + $0x578] ss:$12 sps:$4 sm:$0xff]  }
 0x264   :  { %3166 = vmatpush1.bf16.msra.mxu0 %v6233_v18  ;;  %v6273_v18 = vld [vmem:[#allocation9 + $0x4b0] ss:$12 sps:$4 sm:$0xff]  }
 0x265   :  { %3167 = vmatprep.subr.bf16.mxu0 %v6240_v19  ;;  %v6277_v19 = vld [vmem:[#allocation9 + $0x4b8] ss:$12 sps:$4 sm:$0xff]  }
 0x268   :  { %3168 = vmatpush1.bf16.msra.mxu0 %v6238_v20  ;;  %v6280_v20 = vld [vmem:[#allocation9 + $0x4cc] ss:$12 sps:$4 sm:$0xff]  }
 0x269   :  { %3169 = vmatprep.subr.bf16.mxu0 %v6245_v21  ;;  %v6281_v21 = vld [vmem:[#allocation9 + $0x590] ss:$12 sps:$4 sm:$0xff]  }
 0x26c   :  { %3170 = vmatpush1.bf16.msra.mxu0 %v6243_v22  ;;  %v6278_v22 = vld [vmem:[#allocation9 + $0x4c8] ss:$12 sps:$4 sm:$0xff]  }
 0x26d   :  { %3171 = vmatprep.subr.bf16.mxu0 %v6250_v23  ;;  %v6282_v23 = vld [vmem:[#allocation9 + $0x4d0] ss:$12 sps:$4 sm:$0xff]  }
 0x26e   :  { %v5586_v25 = vpop.f32.mrb[4].mxu1 }
 0x26f   :  { %v5587_v28 = vpop.f32.mrb[5].mxu1 }
 0x270   :  { %v5588_v30 = vadd.f32 %v5587_v28, %v5586_v25  ;;  %v5589_v7 = vpop.f32.mrb[6].mxu1  ;;  %3172 = vmatpush1.bf16.msra.mxu0 %v6248_v24  ;;  %v6285_v24 = vld [vmem:[#allocation9 + $0x4e4] ss:$12 sps:$4 sm:$0xff]   ;;  %v6286_v25 = vld [vmem:[#allocation9 + $0x5a8] ss:$12 sps:$4 sm:$0xff]  }
 0x271   :  { %v5590_v32 = vpop.f32.mrb[7].mxu1  ;;  %3173 = vmatprep.subr.bf16.mxu0 %v6255_v26  ;;  %v6283_v26 = vld [vmem:[#allocation9 + $0x4e0] ss:$12 sps:$4 sm:$0xff]   ;;  %v6290_v28 = vld [vmem:[#allocation9 + $0x4fc] ss:$12 sps:$4 sm:$0xff]  }
 0x272   :  { %v5591_v34 = vadd.f32 %v5590_v32, %v5589_v7  ;;  %v6292_v7 = vld [vmem:[#allocation9 + $0x500] ss:$12 sps:$4 sm:$0xff]  }
 0x273   :  { %v6295_v32 = vld [vmem:[#allocation9 + $0x514] ss:$12 sps:$4 sm:$0xff]  }
 0x274   :  { %3174 = vmatpush1.bf16.msra.mxu0 %v6253_v31  ;;  %v1823_v31 = vrot.slane %v6887_v54, %v6861_v35 }
 0x275   :  { %3175 = vmatprep.subr.bf16.mxu0 %v6260_v38  ;;  %v1827_v38 = vrot.slane %v6887_v54, %v6865_v37  ;;  %v6302_v54 = vld [vmem:[#allocation9 + $0x530] ss:$12 sps:$4 sm:$0xff]  }
 0x278   :  { %3176 = vmatpush1.bf16.msra.mxu0 %v6258_v41  ;;  %v6297_v41 = vld [vmem:[#allocation9 + $0x518] ss:$12 sps:$4 sm:$0xff]  }
 0x279   :  { %3188 = vmatprep.subr.bf16.mxu0 %v6265_v42 }
 0x28e   :  { %v5608_v45 = vpop.f32.mrb[8].mxu1 }
 0x28f   :  { %v5609_v46 = vpop.f32.mrb[9].mxu1 }
 0x290   :  { %v5610_v47 = vadd.f32 %v5609_v46, %v5608_v45  ;;  %v5611_v48 = vpop.f32.mrb[10].mxu1  ;;  %v6300_v45 = vld [vmem:[#allocation9 + $0x52c] ss:$12 sps:$4 sm:$0xff]   ;;  %v6301_v46 = vld [vmem:[#allocation9 + $0x5f0] ss:$12 sps:$4 sm:$0xff]  }
 0x291   :  { %v5612_v49 = vpop.f32.mrb[11].mxu1 }
 0x292   :  { %v6883_v51 = vadd.f32 %v5610_v47, %v5588_v30  ;;  %v5613_v52 = vadd.f32 %v5612_v49, %v5611_v48  ;;  %v6288_v30 = vld [vmem:[#allocation9 + $0x4f8] ss:$12 sps:$4 sm:$0xff]  }
 0x294   :  { %v6885_v53 = vadd.f32 %v5613_v52, %v5591_v34  ;;  %v6296_v34 = vld [vmem:[#allocation9 + $0x5d8] ss:$12 sps:$4 sm:$0xff]  }
 0x2ee   :  { %v2389_v57 = vpop.f32.mrb[12].mxu1 }
 0x2ef   :  { %v5710_v58 = vadd.f32 %v2389_v57, %v1815_v55  ;;  %v2391_v59 = vpop.f32.mrb[13].mxu1 }
 0x2f0   :  { %v5711_v60 = vadd.f32 %v2391_v59, %v1819_v56  ;;  %v2393_v61 = vpop.f32.mrb[14].mxu1  ;;  %v6305_v59 = vld [vmem:[#allocation9 + $0x544] ss:$12 sps:$4 sm:$0xff]  }
 0x2f1   :  { %v5712_v62 = vadd.f32 %v2393_v61, %v1815_v55  ;;  %v2395_v63 = vpop.f32.mrb[15].mxu1  ;;  %v2484_v1 = vmax.f32 %v5710_v58, 0.0 }
 0x2f2   :  { %v5713_v0 = vadd.f32 %v2395_v63, %v1819_v56  ;;  %v2485_v3 = vmax.f32 %v5711_v60, 0.0  ;;  %v6298_v56 = vld [vmem:[#allocation9 + $0x528] ss:$12 sps:$4 sm:$0xff]  }
 0x2f3   :  { %v2488_v2 = vmax.f32 %v5712_v62, 0.0  ;;  %v6308_v60 = vld [vmem:[#allocation6 + $0x24] ss:$48 sps:$4 sm:$0xff]  }
 0x2f4   :  { %v2489_v4 = vmax.f32 %v5713_v0, 0.0 }
 0x2f5   :  { %v2498_v5 = vpack.c.bf16 %v2488_v2, %v2484_v1  ;;  %v6303_v1 = vld [vmem:[#allocation9 + $0x540] ss:$12 sps:$4 sm:$0xff]   ;;  %v6306_v2 = vld [vmem:[#allocation6 + $0x20] ss:$48 sps:$4 sm:$0xff]  }
 0x2f6   :  { %v2499_v6 = vpack.c.bf16 %v2489_v4, %v2485_v3  ;;  %v6311_v3 = vld [vmem:[#allocation9 + $0x55c] ss:$12 sps:$4 sm:$0xff]  }
 0x2f7   :  { %v6314_v4 = vld [vmem:[#allocation6 + $0x84] ss:$48 sps:$4 sm:$0xff]  }
 0x2f8   :  { %3177 = vmatprep.mubr.bf16.mxu0 %v2499_v6  ;;  %3263 = vmatprep.mubr.bf16.mxu1 %v2499_v6  ;;  %v6312_v6 = vld [vmem:[#allocation6 + $0x80] ss:$48 sps:$4 sm:$0xff]  }
 0x2f9   :  { %3178 = vmatmul.mubr.bf16.vlgmr.msra.gmra.mrb[4].mxu0 %v2498_v5  ;;  %3264 = vmatmul.mubr.bf16.vlgmr.msra.gmra.mrb[16].mxu1 %v2498_v5  ;;  %v6309_v5 = vld [vmem:[#allocation9 + $0x558] ss:$12 sps:$4 sm:$0xff]  }
 0x2fa   :  { %3189 = vmatpush1.bf16.msra.mxu0 %v6263_v9  ;;  %5637 = vmatpush3.bf16.msra.mxu1 %v6267_v10  ;;  %v6317_v9 = vld [vmem:[#allocation9 + $0x574] ss:$12 sps:$4 sm:$0xff]   ;;  %v6320_v10 = vld [vmem:[#allocation6 + $0xe4] ss:$48 sps:$4 sm:$0xff]  }
 0x2fb   :  { %3190 = vmatprep.subr.bf16.mxu0 %v6270_v11  ;;  %5638 = vmatprep.subr.bf16.mxu1 %v6271_v12  ;;  %v6315_v11 = vld [vmem:[#allocation9 + $0x570] ss:$12 sps:$4 sm:$0xff]   ;;  %v6318_v12 = vld [vmem:[#allocation6 + $0xe0] ss:$48 sps:$4 sm:$0xff]  }
 0x2fe   :  { %3191 = vmatpush1.bf16.msra.mxu0 %v6268_v13  ;;  %5639 = vmatpush3.bf16.msra.mxu1 %v6272_v14  ;;  %v6323_v13 = vld [vmem:[#allocation9 + $0x58c] ss:$12 sps:$4 sm:$0xff]  }
 0x2ff   :  { %3192 = vmatprep.subr.bf16.mxu0 %v6275_v15  ;;  %5640 = vmatprep.subr.bf16.mxu1 %v6276_v17  ;;  %v6326_v14 = vld [vmem:[#allocation6 + $0x144] ss:$48 sps:$4 sm:$0xff]   ;;  %v6324_v17 = vld [vmem:[#allocation6 + $0x140] ss:$48 sps:$4 sm:$0xff]  }
 0x300   :  { %v6321_v15 = vld [vmem:[#allocation9 + $0x588] ss:$12 sps:$4 sm:$0xff]  }
 0x302   :  { %3193 = vmatpush1.bf16.msra.mxu0 %v6273_v18  ;;  %5641 = vmatpush3.bf16.msra.mxu1 %v6277_v19  ;;  %v6329_v18 = vld [vmem:[#allocation9 + $0x5a4] ss:$12 sps:$4 sm:$0xff]   ;;  %v6332_v19 = vld [vmem:[#allocation6 + $0x1a4] ss:$48 sps:$4 sm:$0xff]  }
 0x303   :  { %3194 = vmatprep.subr.bf16.mxu0 %v6280_v20  ;;  %5642 = vmatprep.subr.bf16.mxu1 %v6281_v21  ;;  %v6327_v20 = vld [vmem:[#allocation9 + $0x5a0] ss:$12 sps:$4 sm:$0xff]   ;;  %v6330_v21 = vld [vmem:[#allocation6 + $0x1a0] ss:$48 sps:$4 sm:$0xff]  }
 0x306   :  { %3195 = vmatpush1.bf16.msra.mxu0 %v6278_v22  ;;  %5643 = vmatpush3.bf16.msra.mxu1 %v6282_v23  ;;  %v6335_v22 = vld [vmem:[#allocation9 + $0x5bc] ss:$12 sps:$4 sm:$0xff]  }
 0x307   :  { %3196 = vmatprep.subr.bf16.mxu0 %v6285_v24  ;;  %5644 = vmatprep.subr.bf16.mxu1 %v6286_v25  ;;  %v6338_v23 = vld [vmem:[#allocation6 + $0x204] ss:$48 sps:$4 sm:$0xff]   ;;  %v6336_v25 = vld [vmem:[#allocation6 + $0x200] ss:$48 sps:$4 sm:$0xff]  }
 0x308   :  { %v6333_v24 = vld [vmem:[#allocation9 + $0x5b8] ss:$12 sps:$4 sm:$0xff]  }
 0x30a   :  { %3197 = vmatpush1.bf16.msra.mxu0 %v6283_v26  ;;  %5645 = vmatpush3.bf16.msra.mxu1 %v6287_v27  ;;  %v6341_v26 = vld [vmem:[#allocation9 + $0x5d4] ss:$12 sps:$4 sm:$0xff]   ;;  %v6344_v27 = vld [vmem:[#allocation6 + $0x264] ss:$48 sps:$4 sm:$0xff]  }
 0x30b   :  { %3198 = vmatprep.subr.bf16.mxu0 %v6290_v28  ;;  %5646 = vmatprep.subr.bf16.mxu1 %v6291_v29  ;;  %v6339_v28 = vld [vmem:[#allocation9 + $0x5d0] ss:$12 sps:$4 sm:$0xff]   ;;  %v6342_v29 = vld [vmem:[#allocation6 + $0x260] ss:$48 sps:$4 sm:$0xff]  }
 0x30e   :  { %3199 = vmatpush1.bf16.msra.mxu0 %v6288_v30  ;;  %5647 = vmatpush3.bf16.msra.mxu1 %v6292_v7  ;;  %v2475_v39 = vpop.f32.mrb[8].mxu0  ;;  %v6347_v30 = vld [vmem:[#allocation9 + $0x5ec] ss:$12 sps:$4 sm:$0xff]  }
 0x30f   :  { %v5714_v42 = vadd.f32 %v2475_v39, %v1823_v31  ;;  %v2477_v43 = vpop.f32.mrb[9].mxu0  ;;  %3200 = vmatprep.subr.bf16.mxu0 %v6295_v32  ;;  %5648 = vmatprep.subr.bf16.mxu1 %v6296_v34  ;;  %v6350_v7 = vld [vmem:[#allocation6 + $0x2c4] ss:$48 sps:$4 sm:$0xff]   ;;  %v6348_v32 = vld [vmem:[#allocation6 + $0x2c0] ss:$48 sps:$4 sm:$0xff]  }
 0x310   :  { %v5715_v47 = vadd.f32 %v2477_v43, %v1827_v38  ;;  %v2479_v48 = vpop.f32.mrb[10].mxu0  ;;  %v6353_v34 = vld [vmem:[#allocation6 + $0x324] ss:$48 sps:$4 sm:$0xff]  }
 0x311   :  { %v5716_v49 = vadd.f32 %v2479_v48, %v1823_v31  ;;  %v2481_v52 = vpop.f32.mrb[11].mxu0  ;;  %v2486_v57 = vmax.f32 %v5714_v42, 0.0  ;;  %v6345_v31 = vld [vmem:[#allocation9 + $0x5e8] ss:$12 sps:$4 sm:$0xff]  }
 0x312   :  { %v5717_v55 = vadd.f32 %v2481_v52, %v1827_v38  ;;  %3201 = vmatpush1.bf16.msra.mxu0 %v6293_v40  ;;  %5649 = vmatpush3.bf16.msra.mxu1 %v6297_v41  ;;  %v2487_v61 = vmax.f32 %v5715_v47, 0.0  ;;  %v6351_v38 = vld [vmem:[#allocation6 + $0x320] ss:$48 sps:$4 sm:$0xff]   ;;  %v6356_v39 = vld [vmem:[#allocation6 + $0x384] ss:$48 sps:$4 sm:$0xff]  }
 0x313   :  { %v2490_v58 = vmax.f32 %v5716_v49, 0.0  ;;  %3202 = vmatprep.subr.bf16.mxu0 %v6300_v45  ;;  %5650 = vmatprep.subr.bf16.mxu1 %v6301_v46  ;;  %v6354_v40 = vld [vmem:[#allocation6 + $0x380] ss:$48 sps:$4 sm:$0xff]   ;;  %v6359_v41 = vld [vmem:[#allocation6 + $0x3e4] ss:$48 sps:$4 sm:$0xff]  }
 0x314   :  { %v2491_v62 = vmax.f32 %v5717_v55, 0.0  ;;  %v6357_v42 = vld [vmem:[#allocation6 + $0x3e0] ss:$48 sps:$4 sm:$0xff]   ;;  %v6362_v43 = vld [vmem:[#allocation6 + $0x444] ss:$48 sps:$4 sm:$0xff]  }
 0x315   :  { %v6897_v63 = vpack.c.bf16 %v2490_v58, %v2486_v57  ;;  %v6360_v45 = vld [vmem:[#allocation6 + $0x440] ss:$48 sps:$4 sm:$0xff]   ;;  %v6365_v46 = vld [vmem:[#allocation6 + $0x4a4] ss:$48 sps:$4 sm:$0xff]  }
 0x316   :  { %v2501_v0 = vpack.c.bf16 %v2491_v62, %v2487_v61  ;;  %3203 = vmatpush1.bf16.msra.mxu0 %v6298_v56  ;;  %5651 = vmatpush3.bf16.msra.mxu1 %v6302_v54  ;;  %v6363_v47 = vld [vmem:[#allocation6 + $0x4a0] ss:$48 sps:$4 sm:$0xff]   ;;  %v6368_v48 = vld [vmem:[#allocation6 + $0x504] ss:$48 sps:$4 sm:$0xff]  }
 0x317   :  { %3204 = vmatprep.subr.bf16.mxu0 %v6305_v59  ;;  %3925 = vmatprep.subr.bf16.mxu1 %v6308_v60  ;;  %v6366_v49 = vld [vmem:[#allocation6 + $0x500] ss:$48 sps:$4 sm:$0xff]   ;;  %v6371_v52 = vld [vmem:[#allocation6 + $0x564] ss:$48 sps:$4 sm:$0xff]  }
 0x318   :  { %3220 = vmatprep.mubr.bf16.mxu0 %v2501_v0  ;;  %3304 = vmatprep.mubr.bf16.mxu1 %v2501_v0  ;;  %v6369_v55 = vld [vmem:[#allocation6 + $0x560] ss:$48 sps:$4 sm:$0xff]   ;;  %v6374_v56 = vld [vmem:[#allocation6 + $0x5c4] ss:$48 sps:$4 sm:$0xff]  }
 0x319   :  { %3305 = vmatmul.mubr.bf16.vlgmr.msra.gmra.mrb[20].mxu1 %v6897_v63  ;;  %v6372_v54 = vld [vmem:[#allocation6 + $0x5c0] ss:$48 sps:$4 sm:$0xff]   ;;  %v6377_v57 = vld [vmem:[#allocation6 + $0x624] ss:$48 sps:$4 sm:$0xff]  }
 0x31a   :  { %3205 = vmatpush1.bf16.msra.mxu0 %v6303_v1  ;;  %3926 = vmatpush1.bf16.msra.mxu1 %v6306_v2  ;;  %v6375_v58 = vld [vmem:[#allocation6 + $0x620] ss:$48 sps:$4 sm:$0xff]   ;;  %v6380_v59 = vld [vmem:[#allocation6 + $0x684] ss:$48 sps:$4 sm:$0xff]  }
 0x31b   :  { %3206 = vmatprep.subr.bf16.mxu0 %v6311_v3  ;;  %3927 = vmatprep.subr.bf16.mxu1 %v6314_v4  ;;  %v6378_v60 = vld [vmem:[#allocation6 + $0x680] ss:$48 sps:$4 sm:$0xff]   ;;  %v6383_v61 = vld [vmem:[#allocation6 + $0x6e4] ss:$48 sps:$4 sm:$0xff]  }
 0x31c   :  { %3957 = vmatprep.mubr.bf16.mxu1 %v6845_v50  ;;  %v6381_v62 = vld [vmem:[#allocation6 + $0x6e0] ss:$48 sps:$4 sm:$0xff]   ;;  %v6389_v1 = vld [vmem:[#allocation6 + $0x7a4] ss:$48 sps:$4 sm:$0xff]  }
 0x31d   :  { %v6384_v0 = vld [vmem:[#allocation6 + $0x740] ss:$48 sps:$4 sm:$0xff]   ;;  %v6392_v3 = vld [vmem:[#allocation6 + $0x804] ss:$48 sps:$4 sm:$0xff]  }
 0x31e   :  { %3207 = vmatpush1.bf16.msra.mxu0 %v6309_v5  ;;  %3928 = vmatpush1.bf16.msra.mxu1 %v6312_v6  ;;  %v6387_v2 = vld [vmem:[#allocation6 + $0x7a0] ss:$48 sps:$4 sm:$0xff]   ;;  %v6395_v5 = vld [vmem:[#allocation6 + $0x864] ss:$48 sps:$4 sm:$0xff]  }
 0x31f   :  { %3208 = vmatprep.subr.bf16.mxu0 %v6317_v9  ;;  %3929 = vmatprep.subr.bf16.mxu1 %v6320_v10  ;;  %v6390_v4 = vld [vmem:[#allocation6 + $0x800] ss:$48 sps:$4 sm:$0xff]   ;;  %v6398_v9 = vld [vmem:[#allocation6 + $0x8c4] ss:$48 sps:$4 sm:$0xff]  }
 0x320   :  { %v6393_v6 = vld [vmem:[#allocation6 + $0x860] ss:$48 sps:$4 sm:$0xff]  }
 0x321   :  { %v6396_v10 = vld [vmem:[#allocation6 + $0x8c0] ss:$48 sps:$4 sm:$0xff]  }
 0x322   :  { %3209 = vmatpush1.bf16.msra.mxu0 %v6315_v11  ;;  %3930 = vmatpush1.bf16.msra.mxu1 %v6318_v12  ;;  %v6401_v11 = vld [vmem:[#allocation6 + $0x2c] ss:$48 sps:$4 sm:$0xff]  }
 0x323   :  { %3210 = vmatprep.subr.bf16.mxu0 %v6323_v13  ;;  %3931 = vmatprep.subr.bf16.mxu1 %v6326_v14  ;;  %v6471_v12 = vld [vmem:[#allocation9 + $0x600] ss:$12 sps:$4 sm:$0xff]   ;;  %v6473_v13 = vld [vmem:[#allocation9 + $0x604] ss:$12 sps:$4 sm:$0xff]   ;;  %v6476_v14 = vld [vmem:[#allocation9 + $0x61c] ss:$12 sps:$4 sm:$0xff]  }
 0x326   :  { %3211 = vmatpush1.bf16.msra.mxu0 %v6321_v15  ;;  %3932 = vmatpush1.bf16.msra.mxu1 %v6324_v17  ;;  %v6399_v15 = vld [vmem:[#allocation6 + $0x28] ss:$48 sps:$4 sm:$0xff]   ;;  %v6404_v17 = vld [vmem:[#allocation6 + $0x8c] ss:$48 sps:$4 sm:$0xff]  }
 0x327   :  { %3212 = vmatprep.subr.bf16.mxu0 %v6329_v18  ;;  %3933 = vmatprep.subr.bf16.mxu1 %v6332_v19  ;;  %v6474_v18 = vld [vmem:[#allocation9 + $0x618] ss:$12 sps:$4 sm:$0xff]   ;;  %v6479_v19 = vld [vmem:[#allocation9 + $0x634] ss:$12 sps:$4 sm:$0xff]  }
 0x32a   :  { %3213 = vmatpush1.bf16.msra.mxu0 %v6327_v20  ;;  %3934 = vmatpush1.bf16.msra.mxu1 %v6330_v21  ;;  %v6402_v20 = vld [vmem:[#allocation6 + $0x88] ss:$48 sps:$4 sm:$0xff]   ;;  %v6407_v21 = vld [vmem:[#allocation6 + $0xec] ss:$48 sps:$4 sm:$0xff]  }
 0x32b   :  { %3214 = vmatprep.subr.bf16.mxu0 %v6335_v22  ;;  %3935 = vmatprep.subr.bf16.mxu1 %v6338_v23  ;;  %v6477_v22 = vld [vmem:[#allocation9 + $0x630] ss:$12 sps:$4 sm:$0xff]   ;;  %v6482_v23 = vld [vmem:[#allocation9 + $0x64c] ss:$12 sps:$4 sm:$0xff]  }
 0x32e   :  { %3215 = vmatpush1.bf16.msra.mxu0 %v6333_v24  ;;  %3936 = vmatpush1.bf16.msra.mxu1 %v6336_v25  ;;  %v6405_v24 = vld [vmem:[#allocation6 + $0xe8] ss:$48 sps:$4 sm:$0xff]   ;;  %v6410_v25 = vld [vmem:[#allocation6 + $0x14c] ss:$48 sps:$4 sm:$0xff]  }
 0x32f   :  { %3216 = vmatprep.subr.bf16.mxu0 %v6341_v26  ;;  %3937 = vmatprep.subr.bf16.mxu1 %v6344_v27  ;;  %v6480_v26 = vld [vmem:[#allocation9 + $0x648] ss:$12 sps:$4 sm:$0xff]   ;;  %v6485_v27 = vld [vmem:[#allocation9 + $0x664] ss:$12 sps:$4 sm:$0xff]  }
 0x332   :  { %3217 = vmatpush1.bf16.msra.mxu0 %v6339_v28  ;;  %3938 = vmatpush1.bf16.msra.mxu1 %v6342_v29  ;;  %v6408_v28 = vld [vmem:[#allocation6 + $0x148] ss:$48 sps:$4 sm:$0xff]   ;;  %v6413_v29 = vld [vmem:[#allocation6 + $0x1ac] ss:$48 sps:$4 sm:$0xff]  }
 0x333   :  { %3218 = vmatprep.subr.bf16.mxu0 %v6347_v30  ;;  %3939 = vmatprep.subr.bf16.mxu1 %v6350_v7  ;;  %v6488_v30 = vld [vmem:[#allocation9 + $0x67c] ss:$12 sps:$4 sm:$0xff]  }
 0x334   :  { %v6411_v7 = vld [vmem:[#allocation6 + $0x1a8] ss:$48 sps:$4 sm:$0xff]  }
 0x336   :  { %3219 = vmatpush1.bf16.msra.mxu0 %v6345_v31  ;;  %3940 = vmatpush1.bf16.msra.mxu1 %v6348_v32  ;;  %v6416_v31 = vld [vmem:[#allocation6 + $0x20c] ss:$48 sps:$4 sm:$0xff]   ;;  %v6486_v32 = vld [vmem:[#allocation9 + $0x678] ss:$12 sps:$4 sm:$0xff]  }
 0x337   :  { %3941 = vmatprep.subr.bf16.mxu1 %v6353_v34  ;;  %4758 = vmatprep.subr.bf16.mxu0 %v6473_v13  ;;  %v6491_v34 = vld [vmem:[#allocation9 + $0x694] ss:$12 sps:$4 sm:$0xff]   ;;  %v6441_v13 = vld [vmem:[#allocation6 + $0x568] ss:$48 sps:$4 sm:$0xff]  }
 0x339   :  { %3221 = vmatmul.mubr.bf16.vlgmr.msra.gmra.mrb[4].mxu0 %v6897_v63  ;;  %v6386_v63 = vld [vmem:[#allocation6 + $0x744] ss:$48 sps:$4 sm:$0xff]  }
 0x33a   :  { %3942 = vmatpush1.bf16.msra.mxu1 %v6351_v38  ;;  %4759 = vmatpush1.bf16.msra.mxu0 %v6471_v12  ;;  %v6414_v38 = vld [vmem:[#allocation6 + $0x208] ss:$48 sps:$4 sm:$0xff]   ;;  %v6443_v12 = vld [vmem:[#allocation6 + $0x56c] ss:$48 sps:$4 sm:$0xff]  }
 0x33b   :  { %3943 = vmatprep.subr.bf16.mxu1 %v6356_v39  ;;  %4760 = vmatprep.subr.bf16.mxu0 %v6476_v14  ;;  %v6419_v39 = vld [vmem:[#allocation6 + $0x26c] ss:$48 sps:$4 sm:$0xff]  }
 0x33c   :  { %v6446_v14 = vld [vmem:[#allocation6 + $0x5cc] ss:$48 sps:$4 sm:$0xff]  }
 0x33e   :  { %3944 = vmatpush1.bf16.msra.mxu1 %v6354_v40  ;;  %4761 = vmatpush1.bf16.msra.mxu0 %v6474_v18  ;;  %v6489_v40 = vld [vmem:[#allocation9 + $0x690] ss:$12 sps:$4 sm:$0xff]  }
 0x33f   :  { %3945 = vmatprep.subr.bf16.mxu1 %v6359_v41  ;;  %4762 = vmatprep.subr.bf16.mxu0 %v6479_v19  ;;  %v6494_v41 = vld [vmem:[#allocation9 + $0x6ac] ss:$12 sps:$4 sm:$0xff]   ;;  %v6452_v19 = vld [vmem:[#allocation6 + $0x68c] ss:$48 sps:$4 sm:$0xff]  }
 0x340   :  { %v6447_v18 = vld [vmem:[#allocation6 + $0x628] ss:$48 sps:$4 sm:$0xff]  }
 0x342   :  { %3946 = vmatpush1.bf16.msra.mxu1 %v6357_v42  ;;  %4763 = vmatpush1.bf16.msra.mxu0 %v6477_v22  ;;  %v6417_v42 = vld [vmem:[#allocation6 + $0x268] ss:$48 sps:$4 sm:$0xff]  }
 0x343   :  { %3947 = vmatprep.subr.bf16.mxu1 %v6362_v43  ;;  %4764 = vmatprep.subr.bf16.mxu0 %v6482_v23  ;;  %v6422_v43 = vld [vmem:[#allocation6 + $0x2cc] ss:$48 sps:$4 sm:$0xff]   ;;  %v6453_v22 = vld [vmem:[#allocation6 + $0x6e8] ss:$48 sps:$4 sm:$0xff]  }
 0x344   :  { %v6458_v23 = vld [vmem:[#allocation6 + $0x74c] ss:$48 sps:$4 sm:$0xff]  }
 0x346   :  { %3948 = vmatpush1.bf16.msra.mxu1 %v6360_v45  ;;  %4765 = vmatpush1.bf16.msra.mxu0 %v6480_v26  ;;  %v6492_v45 = vld [vmem:[#allocation9 + $0x6a8] ss:$12 sps:$4 sm:$0xff]   ;;  %v6459_v26 = vld [vmem:[#allocation6 + $0x7a8] ss:$48 sps:$4 sm:$0xff]  }
 0x347   :  { %3949 = vmatprep.subr.bf16.mxu1 %v6365_v46  ;;  %4766 = vmatprep.subr.bf16.mxu0 %v6485_v27  ;;  %v6497_v46 = vld [vmem:[#allocation9 + $0x6c4] ss:$12 sps:$4 sm:$0xff]  }
 0x348   :  { %v6464_v27 = vld [vmem:[#allocation6 + $0x80c] ss:$48 sps:$4 sm:$0xff]  }
 0x34a   :  { %3950 = vmatpush1.bf16.msra.mxu1 %v6363_v47  ;;  %v6420_v47 = vld [vmem:[#allocation6 + $0x2c8] ss:$48 sps:$4 sm:$0xff]  }
 0x34b   :  { %3951 = vmatprep.subr.bf16.mxu1 %v6368_v48  ;;  %v6425_v48 = vld [vmem:[#allocation6 + $0x32c] ss:$48 sps:$4 sm:$0xff]  }
 0x34e   :  { %3952 = vmatpush1.bf16.msra.mxu1 %v6366_v49  ;;  %v6495_v49 = vld [vmem:[#allocation9 + $0x6c0] ss:$12 sps:$4 sm:$0xff]  }
 0x34f   :  { %3953 = vmatprep.subr.bf16.mxu1 %v6371_v52  ;;  %v6502_v52 = vld [vmem:[#allocation9 + $0x6dc] ss:$12 sps:$4 sm:$0xff]  }
 0x352   :  { %3954 = vmatpush1.bf16.msra.mxu1 %v6369_v55  ;;  %v6423_v55 = vld [vmem:[#allocation6 + $0x328] ss:$48 sps:$4 sm:$0xff]  }
 0x353   :  { %3955 = vmatprep.subr.bf16.mxu1 %v6374_v56  ;;  %v6428_v56 = vld [vmem:[#allocation6 + $0x38c] ss:$48 sps:$4 sm:$0xff]  }
 0x356   :  { %3956 = vmatpush1.bf16.msra.mxu1 %v6372_v54  ;;  %v6500_v54 = vld [vmem:[#allocation9 + $0x6d8] ss:$12 sps:$4 sm:$0xff]  }
 0x357   :  { %3968 = vmatprep.subr.bf16.mxu1 %v6377_v57  ;;  %v6507_v57 = vld [vmem:[#allocation9 + $0x6f4] ss:$12 sps:$4 sm:$0xff]  }
 0x359   :  { %3958 = vmatmul.mubr.bf16.vlgmr.msra.gmra.mrb[24].mxu1 %v6849_v8 }
 0x35a   :  { %3969 = vmatpush1.bf16.msra.mxu1 %v6375_v58  ;;  %4000 = vmatprep.mubr.bf16.mxu1 %v6750_v16  ;;  %v6426_v58 = vld [vmem:[#allocation6 + $0x388] ss:$48 sps:$4 sm:$0xff]  }
 0x35b   :  { %3970 = vmatprep.subr.bf16.mxu1 %v6380_v59  ;;  %v6431_v59 = vld [vmem:[#allocation6 + $0x3ec] ss:$48 sps:$4 sm:$0xff]  }
 0x35e   :  { %3971 = vmatpush1.bf16.msra.mxu1 %v6378_v60  ;;  %v6505_v60 = vld [vmem:[#allocation9 + $0x6f0] ss:$12 sps:$4 sm:$0xff]  }
 0x35f   :  { %3972 = vmatprep.subr.bf16.mxu1 %v6383_v61  ;;  %v6512_v61 = vld [vmem:[#allocation9 + $0x70c] ss:$12 sps:$4 sm:$0xff]  }
 0x362   :  { %3973 = vmatpush1.bf16.msra.mxu1 %v6381_v62  ;;  %v6429_v62 = vld [vmem:[#allocation6 + $0x3e8] ss:$48 sps:$4 sm:$0xff]  }
 0x363   :  { %3974 = vmatprep.subr.bf16.mxu1 %v6386_v63  ;;  %v6434_v63 = vld [vmem:[#allocation6 + $0x44c] ss:$48 sps:$4 sm:$0xff]  }
 0x366   :  { %3975 = vmatpush1.bf16.msra.mxu1 %v6384_v0  ;;  %v6510_v0 = vld [vmem:[#allocation9 + $0x708] ss:$12 sps:$4 sm:$0xff]  }
 0x367   :  { %3976 = vmatprep.subr.bf16.mxu1 %v6389_v1  ;;  %v6517_v1 = vld [vmem:[#allocation9 + $0x724] ss:$12 sps:$4 sm:$0xff]  }
 0x36a   :  { %3977 = vmatpush1.bf16.msra.mxu1 %v6387_v2  ;;  %v6432_v2 = vld [vmem:[#allocation6 + $0x448] ss:$48 sps:$4 sm:$0xff]  }
 0x36b   :  { %3978 = vmatprep.subr.bf16.mxu1 %v6392_v3  ;;  %v6437_v3 = vld [vmem:[#allocation6 + $0x4ac] ss:$48 sps:$4 sm:$0xff]  }
 0x36e   :  { %3979 = vmatpush1.bf16.msra.mxu1 %v6390_v4  ;;  %v6515_v4 = vld [vmem:[#allocation9 + $0x720] ss:$12 sps:$4 sm:$0xff]  }
 0x36f   :  { %3980 = vmatprep.subr.bf16.mxu1 %v6395_v5  ;;  %v6522_v5 = vld [vmem:[#allocation9 + $0x73c] ss:$12 sps:$4 sm:$0xff]  }
 0x372   :  { %3981 = vmatpush1.bf16.msra.mxu1 %v6393_v6  ;;  %v6435_v6 = vld [vmem:[#allocation6 + $0x4a8] ss:$48 sps:$4 sm:$0xff]  }
 0x373   :  { %3982 = vmatprep.subr.bf16.mxu1 %v6398_v9  ;;  %v6440_v9 = vld [vmem:[#allocation6 + $0x50c] ss:$48 sps:$4 sm:$0xff]  }
 0x376   :  { %3983 = vmatpush1.bf16.msra.mxu1 %v6396_v10  ;;  %v6520_v10 = vld [vmem:[#allocation9 + $0x738] ss:$12 sps:$4 sm:$0xff]  }
 0x377   :  { %4011 = vmatprep.subr.bf16.mxu1 %v6401_v11  ;;  %v6438_v11 = vld [vmem:[#allocation6 + $0x508] ss:$48 sps:$4 sm:$0xff]  }
 0x379   :  { %4001 = vmatmul.mubr.bf16.vlgmr.msra.gmra.mrb[24].mxu1 %v6855_v44 }
 0x37a   :  { %4012 = vmatpush1.bf16.msra.mxu1 %v6399_v15  ;;  %4043 = vmatprep.mubr.bf16.mxu1 %v6845_v50  ;;  %v6483_v50 = vld [vmem:[#allocation9 + $0x660] ss:$12 sps:$4 sm:$0xff]  }
 0x37b   :  { %4013 = vmatprep.subr.bf16.mxu1 %v6404_v17  ;;  %4767 = vmatpush1.bf16.msra.mxu0 %v6483_v50  ;;  %v6444_v15 = vld [vmem:[#allocation6 + $0x5c8] ss:$48 sps:$4 sm:$0xff]   ;;  %v6449_v17 = vld [vmem:[#allocation6 + $0x62c] ss:$48 sps:$4 sm:$0xff]  }
 0x37c   :  { %4768 = vmatprep.subr.bf16.mxu0 %v6488_v30  ;;  %v6527_v50 = vld [vmem:[#allocation9 + $0x754] ss:$12 sps:$4 sm:$0xff]  }
 0x37e   :  { %4014 = vmatpush1.bf16.msra.mxu1 %v6402_v20  ;;  %v6450_v20 = vld [vmem:[#allocation6 + $0x688] ss:$48 sps:$4 sm:$0xff]  }
 0x37f   :  { %4015 = vmatprep.subr.bf16.mxu1 %v6407_v21  ;;  %4769 = vmatpush1.bf16.msra.mxu0 %v6486_v32  ;;  %v6455_v21 = vld [vmem:[#allocation6 + $0x6ec] ss:$48 sps:$4 sm:$0xff]  }
 0x380   :  { %4770 = vmatprep.subr.bf16.mxu0 %v6491_v34  ;;  %v6525_v32 = vld [vmem:[#allocation9 + $0x750] ss:$12 sps:$4 sm:$0xff]  }
 0x382   :  { %4016 = vmatpush1.bf16.msra.mxu1 %v6405_v24  ;;  %v6456_v24 = vld [vmem:[#allocation6 + $0x748] ss:$48 sps:$4 sm:$0xff]  }
 0x383   :  { %4017 = vmatprep.subr.bf16.mxu1 %v6410_v25  ;;  %4771 = vmatpush1.bf16.msra.mxu0 %v6489_v40  ;;  %v6461_v25 = vld [vmem:[#allocation6 + $0x7ac] ss:$48 sps:$4 sm:$0xff]   ;;  %v6532_v40 = vld [vmem:[#allocation9 + $0x76c] ss:$12 sps:$4 sm:$0xff]  }
 0x384   :  { %4772 = vmatprep.subr.bf16.mxu0 %v6494_v41  ;;  %v6468_v41 = vld [vmem:[#allocation6 + $0x8c8] ss:$48 sps:$4 sm:$0xff]  }
 0x386   :  { %4018 = vmatpush1.bf16.msra.mxu1 %v6408_v28  ;;  %v6467_v28 = vld [vmem:[#allocation6 + $0x86c] ss:$48 sps:$4 sm:$0xff]  }
 0x387   :  { %4019 = vmatprep.subr.bf16.mxu1 %v6413_v29  ;;  %4773 = vmatpush1.bf16.msra.mxu0 %v6492_v45  ;;  %v6499_v45 = vld [vmem:[#allocation9 + $0x608] ss:$12 sps:$4 sm:$0xff]  }
 0x388   :  { %4774 = vmatprep.subr.bf16.mxu0 %v6497_v46  ;;  %v6503_v46 = vld [vmem:[#allocation9 + $0x6e0] ss:$12 sps:$4 sm:$0xff]  }
 0x38a   :  { %4020 = vmatpush1.bf16.msra.mxu1 %v6411_v7 }
 0x38b   :  { %4021 = vmatprep.subr.bf16.mxu1 %v6416_v31  ;;  %4775 = vmatpush1.bf16.msra.mxu0 %v6495_v49  ;;  %v6465_v31 = vld [vmem:[#allocation6 + $0x868] ss:$48 sps:$4 sm:$0xff]   ;;  %v6508_v49 = vld [vmem:[#allocation9 + $0x6f8] ss:$12 sps:$4 sm:$0xff]  }
 0x38c   :  { %4776 = vmatprep.subr.bf16.mxu0 %v6502_v52  ;;  %v6509_v52 = vld [vmem:[#allocation9 + $0x638] ss:$12 sps:$4 sm:$0xff]  }
 0x38e   :  { %4022 = vmatpush1.bf16.msra.mxu1 %v6414_v38  ;;  %v6470_v38 = vld [vmem:[#allocation6 + $0x8cc] ss:$48 sps:$4 sm:$0xff]  }
 0x38f   :  { %4023 = vmatprep.subr.bf16.mxu1 %v6419_v39  ;;  %4777 = vmatpush1.bf16.msra.mxu0 %v6500_v54  ;;  %v6518_v54 = vld [vmem:[#allocation9 + $0x728] ss:$12 sps:$4 sm:$0xff]  }
 0x390   :  { %4778 = vmatprep.subr.bf16.mxu0 %v6507_v57  ;;  %v6519_v57 = vld [vmem:[#allocation9 + $0x668] ss:$12 sps:$4 sm:$0xff]  }
 0x392   :  { %4024 = vmatpush1.bf16.msra.mxu1 %v6417_v42  ;;  %v6530_v42 = vld [vmem:[#allocation9 + $0x768] ss:$12 sps:$4 sm:$0xff]  }
 0x393   :  { %4025 = vmatprep.subr.bf16.mxu1 %v6422_v43  ;;  %4779 = vmatpush1.bf16.msra.mxu0 %v6505_v60  ;;  %v6498_v43 = vld [vmem:[#allocation9 + $0x6c8] ss:$12 sps:$4 sm:$0xff]  }
 0x394   :  { %4780 = vmatprep.subr.bf16.mxu0 %v6512_v61 }
 0x396   :  { %4026 = vmatpush1.bf16.msra.mxu1 %v6420_v47  ;;  %v6537_v47 = vld [vmem:[#allocation9 + $0x784] ss:$12 sps:$4 sm:$0xff]  }
 0x397   :  { %4027 = vmatprep.subr.bf16.mxu1 %v6425_v48  ;;  %4781 = vmatpush1.bf16.msra.mxu0 %v6510_v0  ;;  %v6504_v48 = vld [vmem:[#allocation9 + $0x620] ss:$12 sps:$4 sm:$0xff]   ;;  %v6529_v0 = vld [vmem:[#allocation9 + $0x698] ss:$12 sps:$4 sm:$0xff]  }
 0x398   :  { %4782 = vmatprep.subr.bf16.mxu0 %v6517_v1 }
 0x39a   :  { %4028 = vmatpush1.bf16.msra.mxu1 %v6423_v55  ;;  %v6513_v55 = vld [vmem:[#allocation9 + $0x710] ss:$12 sps:$4 sm:$0xff]  }
 0x39b   :  { %4029 = vmatprep.subr.bf16.mxu1 %v6428_v56  ;;  %4783 = vmatpush1.bf16.msra.mxu0 %v6515_v4  ;;  %v6514_v56 = vld [vmem:[#allocation9 + $0x650] ss:$12 sps:$4 sm:$0xff]  }
 0x39c   :  { %4784 = vmatprep.subr.bf16.mxu0 %v6522_v5 }
 0x39e   :  { %4030 = vmatpush1.bf16.msra.mxu1 %v6426_v58  ;;  %v6523_v58 = vld [vmem:[#allocation9 + $0x740] ss:$12 sps:$4 sm:$0xff]  }
 0x39f   :  { %4031 = vmatprep.subr.bf16.mxu1 %v6431_v59  ;;  %4785 = vmatpush1.bf16.msra.mxu0 %v6520_v10  ;;  %v6524_v59 = vld [vmem:[#allocation9 + $0x680] ss:$12 sps:$4 sm:$0xff]  }
 0x3a0   :  { %4786 = vmatprep.subr.bf16.mxu0 %v6527_v50  ;;  %v6538_v50 = vld [vmem:[#allocation9 + $0x798] ss:$12 sps:$4 sm:$0xff]  }
 0x3a2   :  { %4032 = vmatpush1.bf16.msra.mxu1 %v6429_v62 }
 0x3a3   :  { %4033 = vmatprep.subr.bf16.mxu1 %v6434_v63  ;;  %4787 = vmatpush1.bf16.msra.mxu0 %v6525_v32  ;;  %v6541_v32 = vld [vmem:[#allocation9 + $0x7b0] ss:$12 sps:$4 sm:$0xff]  }
 0x3a4   :  { %4788 = vmatprep.subr.bf16.mxu0 %v6532_v40  ;;  %v6544_v40 = vld [vmem:[#allocation9 + $0x7c8] ss:$12 sps:$4 sm:$0xff]  }
 0x3a6   :  { %4034 = vmatpush1.bf16.msra.mxu1 %v6432_v2  ;;  %v6533_v2 = vld [vmem:[#allocation9 + $0x770] ss:$12 sps:$4 sm:$0xff]  }
 0x3a7   :  { %4035 = vmatprep.subr.bf16.mxu1 %v6437_v3  ;;  %4789 = vmatpush1.bf16.msra.mxu0 %v6530_v42  ;;  %v6549_v42 = vld [vmem:[#allocation9 + $0x7e4] ss:$12 sps:$4 sm:$0xff]  }
 0x3a8   :  { %4801 = vmatprep.subr.bf16.mxu0 %v6537_v47  ;;  %v6552_v47 = vld [vmem:[#allocation9 + $0x7fc] ss:$12 sps:$4 sm:$0xff]  }
 0x3aa   :  { %4036 = vmatpush1.bf16.msra.mxu1 %v6435_v6 }
 0x3ab   :  { %4037 = vmatprep.subr.bf16.mxu1 %v6440_v9  ;;  %v6534_v9 = vld [vmem:[#allocation9 + $0x6b0] ss:$12 sps:$4 sm:$0xff]  }
 0x3ae   :  { %4038 = vmatpush1.bf16.msra.mxu1 %v6438_v11  ;;  %v6562_v11 = vld [vmem:[#allocation9 + $0x848] ss:$12 sps:$4 sm:$0xff]  }
 0x3af   :  { %4039 = vmatprep.subr.bf16.mxu1 %v6443_v12  ;;  %v6915_v12 = vld [vmem:[#allocation8 + $0x8] sm:$0xf] }
 0x3b2   :  { %4040 = vmatpush1.bf16.msra.mxu1 %v6441_v13  ;;  %v3428_v13 = vrot.slane %v6915_v12, %v6859_v33 }
 0x3b3   :  { %4041 = vmatprep.subr.bf16.mxu1 %v6446_v14  ;;  %v3432_v14 = vrot.slane %v6915_v12, %v6863_v36 }
 0x3b6   :  { %4042 = vmatpush1.bf16.msra.mxu1 %v6444_v15 }
 0x3b7   :  { %4054 = vmatprep.subr.bf16.mxu1 %v6449_v17 }
 0x3b9   :  { %4044 = vmatmul.mubr.bf16.vlgmr.msra.gmra.mrb[28].mxu1 %v6849_v8  ;;  %v6462_v8 = vld [vmem:[#allocation6 + $0x808] ss:$48 sps:$4 sm:$0xff]  }
 0x3ba   :  { %4055 = vmatpush1.bf16.msra.mxu1 %v6447_v18  ;;  %4086 = vmatprep.mubr.bf16.mxu1 %v6750_v16 }
 0x3bb   :  { %4056 = vmatprep.subr.bf16.mxu1 %v6452_v19 }
 0x3be   :  { %4057 = vmatpush1.bf16.msra.mxu1 %v6450_v20 }
 0x3bf   :  { %4058 = vmatprep.subr.bf16.mxu1 %v6455_v21 }
 0x3c2   :  { %4059 = vmatpush1.bf16.msra.mxu1 %v6453_v22 }
 0x3c3   :  { %4060 = vmatprep.subr.bf16.mxu1 %v6458_v23 }
 0x3c6   :  { %4061 = vmatpush1.bf16.msra.mxu1 %v6456_v24 }
 0x3c7   :  { %4062 = vmatprep.subr.bf16.mxu1 %v6461_v25 }
 0x3ca   :  { %4063 = vmatpush1.bf16.msra.mxu1 %v6459_v26 }
 0x3cb   :  { %4064 = vmatprep.subr.bf16.mxu1 %v6464_v27 }
 0x3cc   :  { %v5630_v29 = vpop.f32.mrb[16].mxu1 }
 0x3cd   :  { %v5631_v16 = vpop.f32.mrb[17].mxu1 }
 0x3ce   :  { %v5632_v30 = vadd.f32 %v5631_v16, %v5630_v29  ;;  %4065 = vmatpush1.bf16.msra.mxu1 %v6462_v8  ;;  %v5633_v7 = vpop.f32.mrb[18].mxu1  ;;  %v6535_v8 = vld [vmem:[#allocation9 + $0x780] ss:$12 sps:$4 sm:$0xff]   ;;  %v6540_v29 = vld [vmem:[#allocation9 + $0x79c] ss:$12 sps:$4 sm:$0xff]  }
 0x3cf   :  { %v5634_v34 = vpop.f32.mrb[19].mxu1  ;;  %4066 = vmatprep.subr.bf16.mxu1 %v6467_v28  ;;  %v6563_v28 = vld [vmem:[#allocation9 + $0x788] ss:$12 sps:$4 sm:$0xff]   ;;  %v6567_v16 = vld [vmem:[#allocation9 + $0x860] ss:$12 sps:$4 sm:$0xff]  }
 0x3d0   :  { %v5635_v39 = vadd.f32 %v5634_v34, %v5633_v7  ;;  %v6543_v7 = vld [vmem:[#allocation9 + $0x7b4] ss:$12 sps:$4 sm:$0xff]   ;;  %v6573_v34 = vld [vmem:[#allocation9 + $0x7b8] ss:$12 sps:$4 sm:$0xff]  }
 0x3d2   :  { %4067 = vmatpush1.bf16.msra.mxu1 %v6465_v31  ;;  %v6572_v31 = vld [vmem:[#allocation9 + $0x878] ss:$12 sps:$4 sm:$0xff]  }
 0x3d3   :  { %4068 = vmatprep.subr.bf16.mxu1 %v6470_v38  ;;  %v6546_v38 = vld [vmem:[#allocation9 + $0x7cc] ss:$12 sps:$4 sm:$0xff]  }
 0x3d6   :  { %4069 = vmatpush1.bf16.msra.mxu1 %v6468_v41  ;;  %v6578_v41 = vld [vmem:[#allocation9 + $0x7d0] ss:$12 sps:$4 sm:$0xff]  }
 0x3d7   :  { %5658 = vmatprep.subr.bf16.mxu1 %v6498_v43  ;;  %v6582_v43 = vld [vmem:[#allocation9 + $0x8a8] ss:$12 sps:$4 sm:$0xff]  }
 0x3d9   :  { %4087 = vmatmul.mubr.bf16.vlgmr.msra.gmra.mrb[28].mxu1 %v6855_v44  ;;  %v6528_v44 = vld [vmem:[#allocation9 + $0x758] ss:$12 sps:$4 sm:$0xff]  }
 0x3da   :  { %5659 = vmatpush3.bf16.msra.mxu1 %v6499_v45  ;;  %v6547_v45 = vld [vmem:[#allocation9 + $0x7e0] ss:$12 sps:$4 sm:$0xff]  }
 0x3db   :  { %5660 = vmatprep.subr.bf16.mxu1 %v6503_v46  ;;  %v6583_v46 = vld [vmem:[#allocation9 + $0x7e8] ss:$12 sps:$4 sm:$0xff]  }
 0x3de   :  { %5661 = vmatpush3.bf16.msra.mxu1 %v6504_v48  ;;  %v6587_v48 = vld [vmem:[#allocation9 + $0x8c0] ss:$12 sps:$4 sm:$0xff]  }
 0x3df   :  { %5662 = vmatprep.subr.bf16.mxu1 %v6508_v49  ;;  %v6550_v49 = vld [vmem:[#allocation9 + $0x7f8] ss:$12 sps:$4 sm:$0xff]  }
 0x3e2   :  { %5663 = vmatpush3.bf16.msra.mxu1 %v6509_v52  ;;  %v6588_v52 = vld [vmem:[#allocation9 + $0x800] ss:$12 sps:$4 sm:$0xff]  }
 0x3e3   :  { %5664 = vmatprep.subr.bf16.mxu1 %v6513_v55  ;;  %v6555_v55 = vld [vmem:[#allocation9 + $0x814] ss:$12 sps:$4 sm:$0xff]  }
 0x3e6   :  { %5665 = vmatpush3.bf16.msra.mxu1 %v6514_v56  ;;  %v6592_v56 = vld [vmem:[#allocation9 + $0x8d8] ss:$12 sps:$4 sm:$0xff]  }
 0x3e7   :  { %5666 = vmatprep.subr.bf16.mxu1 %v6518_v54  ;;  %v6553_v54 = vld [vmem:[#allocation9 + $0x810] ss:$12 sps:$4 sm:$0xff]  }
 0x3ea   :  { %5667 = vmatpush3.bf16.msra.mxu1 %v6519_v57  ;;  %v6593_v57 = vld [vmem:[#allocation9 + $0x818] ss:$12 sps:$4 sm:$0xff]  }
 0x3eb   :  { %5668 = vmatprep.subr.bf16.mxu1 %v6523_v58  ;;  %v6558_v58 = vld [vmem:[#allocation9 + $0x82c] ss:$12 sps:$4 sm:$0xff]  }
 0x3ec   :  { %v5652_v60 = vpop.f32.mrb[20].mxu1 }
 0x3ed   :  { %v5653_v61 = vpop.f32.mrb[21].mxu1 }
 0x3ee   :  { %v5654_v62 = vadd.f32 %v5653_v61, %v5652_v60  ;;  %v5655_v63 = vpop.f32.mrb[22].mxu1  ;;  %5669 = vmatpush3.bf16.msra.mxu1 %v6524_v59  ;;  %v6597_v59 = vld [vmem:[#allocation9 + $0x8f0] ss:$12 sps:$4 sm:$0xff]  }
 0x3ef   :  { %v5656_v1 = vpop.f32.mrb[23].mxu1  ;;  %5670 = vmatprep.subr.bf16.mxu1 %v6528_v44  ;;  %v6556_v44 = vld [vmem:[#allocation9 + $0x828] ss:$12 sps:$4 sm:$0xff]   ;;  %v6598_v60 = vld [vmem:[#allocation9 + $0x830] ss:$12 sps:$4 sm:$0xff]  }
 0x3f0   :  { %v3307_v3 = vadd.f32 %v5654_v62, %v5632_v30  ;;  %v5657_v4 = vadd.f32 %v5656_v1, %v5655_v63  ;;  %v6568_v30 = vld [vmem:[#allocation9 + $0x7a0] ss:$12 sps:$4 sm:$0xff]   ;;  %v6561_v61 = vld [vmem:[#allocation9 + $0x844] ss:$12 sps:$4 sm:$0xff]   ;;  %v6566_v63 = vld [vmem:[#allocation9 + $0x85c] ss:$12 sps:$4 sm:$0xff]  }
 0x3f1   :  { %v6559_v62 = vld [vmem:[#allocation9 + $0x840] ss:$12 sps:$4 sm:$0xff]  }
 0x3f2   :  { %v6910_v5 = vadd.f32 %v3307_v3, %v6883_v51  ;;  %v3310_v6 = vadd.f32 %v5657_v4, %v5635_v39  ;;  %5671 = vmatpush3.bf16.msra.mxu1 %v6529_v0  ;;  %v6577_v39 = vld [vmem:[#allocation9 + $0x890] ss:$12 sps:$4 sm:$0xff]   ;;  %v6564_v0 = vld [vmem:[#allocation9 + $0x858] ss:$12 sps:$4 sm:$0xff]   ;;  %v6571_v1 = vld [vmem:[#allocation9 + $0x874] ss:$12 sps:$4 sm:$0xff]  }
 0x3f3   :  { %5672 = vmatprep.subr.bf16.mxu1 %v6533_v2  ;;  %v6569_v2 = vld [vmem:[#allocation9 + $0x870] ss:$12 sps:$4 sm:$0xff]   ;;  %v6576_v3 = vld [vmem:[#allocation9 + $0x88c] ss:$12 sps:$4 sm:$0xff]   ;;  %v6574_v4 = vld [vmem:[#allocation9 + $0x888] ss:$12 sps:$4 sm:$0xff]  }
 0x3f4   :  { %v6913_v10 = vadd.f32 %v3310_v6, %v6885_v53  ;;  %v6581_v6 = vld [vmem:[#allocation9 + $0x8a4] ss:$12 sps:$4 sm:$0xff]  }
 0x3f6   :  { %5673 = vmatpush3.bf16.msra.mxu1 %v6534_v9  ;;  %v6579_v9 = vld [vmem:[#allocation9 + $0x8a0] ss:$12 sps:$4 sm:$0xff]  }
 0x3f7   :  { %5680 = vmatprep.subr.bf16.mxu1 %v6562_v11  ;;  %v6586_v11 = vld [vmem:[#allocation9 + $0x8bc] ss:$12 sps:$4 sm:$0xff]  }
 0x44c   :  { %v4002_v51 = vpop.f32.mrb[24].mxu1 }
 0x44d   :  { %v5718_v15 = vadd.f32 %v4002_v51, %v3428_v13  ;;  %v4004_v17 = vpop.f32.mrb[25].mxu1  ;;  %v6589_v51 = vld [vmem:[#allocation9 + $0x8d0] ss:$12 sps:$4 sm:$0xff]  }
 0x44e   :  { %v5719_v18 = vadd.f32 %v4004_v17, %v3432_v14  ;;  %v4006_v19 = vpop.f32.mrb[26].mxu1  ;;  %v6594_v17 = vld [vmem:[#allocation9 + $0x8e8] ss:$12 sps:$4 sm:$0xff]  }
 0x44f   :  { %v5720_v20 = vadd.f32 %v4006_v19, %v3428_v13  ;;  %v4008_v21 = vpop.f32.mrb[27].mxu1  ;;  %v4097_v22 = vmax.f32 %v5718_v15, 0.0  ;;  %v6584_v13 = vld [vmem:[#allocation9 + $0x8b8] ss:$12 sps:$4 sm:$0xff]   ;;  %v3440_v19 = vrot.slane %v6915_v12, %v6865_v37 }
 0x450   :  { %v5721_v53 = vadd.f32 %v4008_v21, %v3432_v14  ;;  %v4098_v24 = vmax.f32 %v5719_v18, 0.0  ;;  %v6591_v14 = vld [vmem:[#allocation9 + $0x8d4] ss:$12 sps:$4 sm:$0xff]   ;;  %v6596_v15 = vld [vmem:[#allocation9 + $0x8ec] ss:$12 sps:$4 sm:$0xff]   ;;  %v3436_v18 = vrot.slane %v6915_v12, %v6861_v35 }
 0x451   :  { %v4101_v23 = vmax.f32 %v5720_v20, 0.0 }
 0x452   :  { %v4102_v25 = vmax.f32 %v5721_v53, 0.0 }
 0x453   :  { %v4111_v26 = vpack.c.bf16 %v4101_v23, %v4097_v22 }
 0x454   :  { %v4112_v27 = vpack.c.bf16 %v4102_v25, %v4098_v24 }
 0x456   :  { %4790 = vmatprep.mubr.bf16.mxu0 %v4112_v27  ;;  %4876 = vmatprep.mubr.bf16.mxu1 %v4112_v27 }
 0x457   :  { %4791 = vmatmul.mubr.bf16.vlgmr.msra.gmra.mrb[4].mxu0 %v4111_v26  ;;  %4877 = vmatmul.mubr.bf16.vlgmr.msra.gmra.mrb[32].mxu1 %v4111_v26 }
 0x458   :  { %4802 = vmatpush1.bf16.msra.mxu0 %v6535_v8  ;;  %5681 = vmatpush3.bf16.msra.mxu1 %v6563_v28 }
 0x459   :  { %4803 = vmatprep.subr.bf16.mxu0 %v6540_v29  ;;  %5682 = vmatprep.subr.bf16.mxu1 %v6567_v16 }
 0x45c   :  { %4804 = vmatpush1.bf16.msra.mxu0 %v6538_v50  ;;  %5683 = vmatpush3.bf16.msra.mxu1 %v6568_v30 }
 0x45d   :  { %4805 = vmatprep.subr.bf16.mxu0 %v6543_v7  ;;  %5684 = vmatprep.subr.bf16.mxu1 %v6572_v31 }
 0x460   :  { %4806 = vmatpush1.bf16.msra.mxu0 %v6541_v32  ;;  %5685 = vmatpush3.bf16.msra.mxu1 %v6573_v34  ;;  %v4944_v34 = vld [vmem:[#allocation11] sm:$0x7] }
 0x461   :  { %4807 = vmatprep.subr.bf16.mxu0 %v6546_v38  ;;  %5686 = vmatprep.subr.bf16.mxu1 %v6577_v39  ;;  %v4949_v38 = vrot.slane %v4944_v34, %v6859_v33  ;;  %v4953_v39 = vrot.slane %v4944_v34, %v6863_v36 }
 0x464   :  { %4808 = vmatpush1.bf16.msra.mxu0 %v6544_v40  ;;  %5687 = vmatpush3.bf16.msra.mxu1 %v6578_v41 }
 0x465   :  { %4809 = vmatprep.subr.bf16.mxu0 %v6549_v42  ;;  %5688 = vmatprep.subr.bf16.mxu1 %v6582_v43 }
 0x468   :  { %4810 = vmatpush1.bf16.msra.mxu0 %v6547_v45  ;;  %5689 = vmatpush3.bf16.msra.mxu1 %v6583_v46 }
 0x469   :  { %4811 = vmatprep.subr.bf16.mxu0 %v6552_v47  ;;  %5690 = vmatprep.subr.bf16.mxu1 %v6587_v48 }
 0x46c   :  { %4812 = vmatpush1.bf16.msra.mxu0 %v6550_v49  ;;  %5691 = vmatpush3.bf16.msra.mxu1 %v6588_v52 }
 0x46d   :  { %4813 = vmatprep.subr.bf16.mxu0 %v6555_v55  ;;  %5692 = vmatprep.subr.bf16.mxu1 %v6592_v56 }
 0x470   :  { %4814 = vmatpush1.bf16.msra.mxu0 %v6553_v54  ;;  %5693 = vmatpush3.bf16.msra.mxu1 %v6593_v57  ;;  %v4957_v54 = vrot.slane %v4944_v34, %v6861_v35 }
 0x471   :  { %4815 = vmatprep.subr.bf16.mxu0 %v6558_v58  ;;  %5694 = vmatprep.subr.bf16.mxu1 %v6597_v59 }
 0x474   :  { %4816 = vmatpush1.bf16.msra.mxu0 %v6556_v44  ;;  %5695 = vmatpush3.bf16.msra.mxu1 %v6598_v60 }
 0x475   :  { %4817 = vmatprep.subr.bf16.mxu0 %v6561_v61 }
 0x478   :  { %4818 = vmatpush1.bf16.msra.mxu0 %v6559_v62 }
 0x479   :  { %4819 = vmatprep.subr.bf16.mxu0 %v6566_v63 }
 0x47c   :  { %4820 = vmatpush1.bf16.msra.mxu0 %v6564_v0 }
 0x47d   :  { %4821 = vmatprep.subr.bf16.mxu0 %v6571_v1 }
 0x480   :  { %4822 = vmatpush1.bf16.msra.mxu0 %v6569_v2 }
 0x481   :  { %4823 = vmatprep.subr.bf16.mxu0 %v6576_v3 }
 0x484   :  { %4824 = vmatpush1.bf16.msra.mxu0 %v6574_v4 }
 0x485   :  { %4825 = vmatprep.subr.bf16.mxu0 %v6581_v6 }
 0x488   :  { %4826 = vmatpush1.bf16.msra.mxu0 %v6579_v9 }
 0x489   :  { %4827 = vmatprep.subr.bf16.mxu0 %v6586_v11 }
 0x48c   :  { %4828 = vmatpush1.bf16.msra.mxu0 %v6584_v13 }
 0x48d   :  { %4829 = vmatprep.subr.bf16.mxu0 %v6591_v14 }
 0x490   :  { %4830 = vmatpush1.bf16.msra.mxu0 %v6589_v51 }
 0x491   :  { %4831 = vmatprep.subr.bf16.mxu0 %v6596_v15 }
 0x494   :  { %4832 = vmatpush1.bf16.msra.mxu0 %v6594_v17 }
 0x4ac   :  { %v4088_v20 = vpop.f32.mrb[28].mxu1 }
 0x4ad   :  { %v5722_v21 = vadd.f32 %v4088_v20, %v3436_v18  ;;  %v4090_v53 = vpop.f32.mrb[29].mxu1 }
 0x4ae   :  { %v5723_v22 = vadd.f32 %v4090_v53, %v3440_v19  ;;  %v4092_v23 = vpop.f32.mrb[30].mxu1 }
 0x4af   :  { %v5724_v24 = vadd.f32 %v4092_v23, %v3436_v18  ;;  %v4094_v25 = vpop.f32.mrb[31].mxu1  ;;  %v4099_v27 = vmax.f32 %v5722_v21, 0.0 }
 0x4b0   :  { %v5725_v26 = vadd.f32 %v4094_v25, %v3440_v19  ;;  %v4100_v28 = vmax.f32 %v5723_v22, 0.0 }
 0x4b1   :  { %v4103_v8 = vmax.f32 %v5724_v24, 0.0 }
 0x4b2   :  { %v4104_v29 = vmax.f32 %v5725_v26, 0.0 }
 0x4b3   :  { %v4113_v16 = vpack.c.bf16 %v4103_v8, %v4099_v27 }
 0x4b4   :  { %v4114_v50 = vpack.c.bf16 %v4104_v29, %v4100_v28 }
 0x4b6   :  { %4833 = vmatprep.mubr.bf16.mxu0 %v4114_v50  ;;  %4917 = vmatprep.mubr.bf16.mxu1 %v4114_v50 }
 0x4b7   :  { %4834 = vmatmul.mubr.bf16.vlgmr.msra.gmra.mrb[4].mxu0 %v4113_v16  ;;  %4918 = vmatmul.mubr.bf16.vlgmr.msra.gmra.mrb[36].mxu1 %v4113_v16 }
 0x52a   :  { %v5674_v30 = vpop.f32.mrb[32].mxu1 }
 0x52b   :  { %v5675_v37 = vpop.f32.mrb[33].mxu1 }
 0x52c   :  { %v5676_v12 = vadd.f32 %v5675_v37, %v5674_v30  ;;  %v5677_v7 = vpop.f32.mrb[34].mxu1 }
 0x52d   :  { %v5678_v31 = vpop.f32.mrb[35].mxu1 }
 0x52e   :  { %v5679_v32 = vadd.f32 %v5678_v31, %v5677_v7 }
 0x58a   :  { %v4835_v40 = vpop.f32.mrb[4].mxu0  ;;  %v5696_v41 = vpop.f32.mrb[36].mxu1 }
 0x58b   :  { %v4961_v42 = vadd.f32 %v4949_v38, %v4835_v40  ;;  %v4837_v43 = vpop.f32.mrb[5].mxu0  ;;  %v5697_v45 = vpop.f32.mrb[37].mxu1 }
 0x58c   :  { %v4962_v46 = vadd.f32 %v4953_v39, %v4837_v43  ;;  %v5698_v47 = vadd.f32 %v5697_v45, %v5696_v41  ;;  %v4839_v48 = vpop.f32.mrb[6].mxu0  ;;  %v5699_v49 = vpop.f32.mrb[38].mxu1 }
 0x58d   :  { %4967 = vst [vmem:[#allocation12] sm:$0xff] %v4961_v42  ;;  %v4964_v52 = vadd.f32 %v4949_v38, %v4839_v48  ;;  %v4841_v55 = vpop.f32.mrb[7].mxu0  ;;  %v5700_v56 = vpop.f32.mrb[39].mxu1 }
 0x58e   :  { %4968 = vst [vmem:[#allocation12 + $0x8] sm:$0xff] %v4962_v46  ;;  %v4920_v57 = vadd.f32 %v5698_v47, %v5676_v12  ;;  %v4965_v33 = vadd.f32 %v4953_v39, %v4841_v55  ;;  %v5701_v58 = vadd.f32 %v5700_v56, %v5699_v49 }
 0x58f   :  { %4970 = vst [vmem:[#allocation12 + $0x18] sm:$0xff] %v4964_v52 }
 0x590   :  { %v4928_v36 = vadd.f32 %v4920_v57, %v6910_v5  ;;  %4971 = vst [vmem:[#allocation12 + $0x20] sm:$0xff] %v4965_v33  ;;  %v4923_v59 = vadd.f32 %v5701_v58, %v5679_v32 }
 0x592   :  { %v4963_v44 = vadd.f32 %v4957_v54, %v4928_v36  ;;  %v4931_v60 = vadd.f32 %v4923_v59, %v6913_v10 }
 0x594   :  { %4969 = vst [vmem:[#allocation12 + $0x10] sm:$0xff] %v4963_v44  ;;  %v4966_v61 = vadd.f32 %v4957_v54, %v4931_v60 }
 0x596   :  { %4972 = vst [vmem:[#allocation12 + $0x28] sm:$0xff] %v4966_v61 }
 0x597   :  { %6720 = shalt.err (!%p6717_p2)
}
 0x598   :  { %s6721_s10 = scalar_lea.hbm %s6950_s5, 768 }
 0x599   :  { %p6722_p3 = scmp.ne.s32.totalorder %s6950_s5, %s6721_s10  ;;  %p6725_p4 = scmp.lt.u32.totalorder %s6721_s10, %s6950_s5 }
 0x59b   :  { %p6727_p5 = pnand %p6725_p4, %p6722_p3 }
 0x59d   :  { %6730 = shalt.err (!%p6727_p5)
}
 0x59e   :  { %4984 = dma.vmem_to_hbm [thread:$0]  %s4979_s6, 768, %s6950_s5, [#allocation5], %s6746_s3, %s6746_s3, %s6747_s30  }
 0x59f   :  { %6737 = dma.done.wait [#allocation5], 768  }
 0x5a0   :  { %6738 = vsyncadd [#allocation5], 4294966528 }
 0x5a1   :  { %4988 = vsyncpa [#allocation4], 1 }
 0x5a2   :  { %4989 = vsyncpa [#allocation7], 1 }
 0x5a3   :  { %4990 = vsyncpa [#allocation10], 1 }
 0x5a4   :  { %4991 = vsyncpa [#allocation5], 1 }

</bundles_post_ra>
